<compile_context>
chip_gen: v7x
topology: tpu7x:2x2x1
jax: 0.10.0
libtpu: 0.0.40
codegen_flags: <defaults>
</compile_context>

<pallas_src>
import math
import numpy as np

import jax
import jax.numpy as jnp
from jax import lax
from jax.experimental import pallas as pl
from jax.experimental.pallas import tpu as pltpu

LEAKY_SLOPE = 0.01   # InPlaceABNSync default activation: leaky_relu(0.01)
BN_EPS = 1e-5
LANE = 128           # TPU lane width; Cout/Cin padded up to multiples of this


def _round_up(x, m):
    return (x + m - 1) // m * m


def _leaky_relu(x):
    return jnp.where(x >= 0, x, LEAKY_SLOPE * x)


def _bn_scale_shift(gamma, beta, mean, var):
    scale = gamma / jnp.sqrt(var + BN_EPS)
    shift = beta - mean * scale
    return scale, shift


def _adaptive_pool_matrix(in_size, out_size):
    # AdaptiveAvgPool2d region boundaries: [floor(i*in/out), ceil((i+1)*in/out))
    P = np.zeros((out_size, in_size), np.float32)
    for i in range(out_size):
        start = (i * in_size) // out_size
        end = int(math.ceil((i + 1) * in_size / out_size))
        P[i, start:end] = 1.0 / (end - start)
    return jnp.asarray(P)


def _bilinear_matrix(out_size, in_size):
    # F.interpolate(mode='bilinear', align_corners=True) as separable 1-D weights
    U = np.zeros((out_size, in_size), np.float32)
    if in_size == 1:
        U[:, 0] = 1.0
    else:
        for i in range(out_size):
            src = 0.0 if out_size == 1 else i * (in_size - 1) / (out_size - 1)
            i0 = int(np.floor(src))
            i1 = min(i0 + 1, in_size - 1)
            w1 = src - i0
            U[i, i0] += 1.0 - w1
            U[i, i1] += w1
    return jnp.asarray(U)


def _tpu_vmem_capacity_bytes():
    try:
        return int(pltpu.get_tpu_info().vmem_capacity_bytes)
    except Exception:
        return 64 * 1024 * 1024   # conservative: v7x per-TC VMEM


# ----------------------------------------------------------------------------
# Pallas kernel: fused 3x3 conv (9 accumulated matmuls over shifted windows of
# a resident padded tile) + folded-BN shift + LeakyReLU.
# ----------------------------------------------------------------------------
def _make_bottleneck_kernel(H, W, TH, Cin_p, TN):
    TM = TH * W  # flattened output pixels per row tile

    def kernel(xp_ref, w_ref, shift_ref, o_ref):
        # xp_ref:    (1, H+2, W+2, Cin_p) bf16 -- zero-padded NHWC image, batch n;
        #                                         resident across (j, m) grid steps
        # w_ref:     (9, Cin_p, TN)       bf16 -- BN-scale-folded 3x3 weights, cout
        #                                         tile j; resident across row tiles
        # shift_ref: (1, TN)              f32  -- folded BN shift
        # o_ref:     (1, TM, TN)          bf16 -- lane-dense output tile
        row0 = pl.multiple_of(pl.program_id(2) * TH, TH)   # first image row of tile
        acc = jnp.zeros((TM, TN), jnp.float32)             # vreg-resident accumulator
        # 3 width-shifted slabs (one unaligned slice per kw) instead of 9; the
        # 3 kh windows are free leading-dim slices of the loaded slab.
        for kw in range(3):
            slab = xp_ref[0, pl.ds(row0, TH + 2), kw:kw + W, :]   # (TH+2, W, Cin_p)
            for kh in range(3):
                lhs = slab[kh:kh + TH].reshape(TM, Cin_p)
                acc = acc + jnp.dot(lhs, w_ref[kh * 3 + kw],
                                    preferred_element_type=jnp.float32)
        y = acc + shift_ref[...]
        o_ref[0] = jnp.where(y >= 0, y, LEAKY_SLOPE * y).astype(o_ref.dtype)

    return kernel


def bottleneck_conv3x3_bn_lrelu(cat_nhwc, w_oihw, scale, shift):
    """Fused 3x3 conv (pad=1, no bias) + BN affine + LeakyReLU. NHWC in, NCHW out."""
    N, H, W, Cin = cat_nhwc.shape
    Cout = w_oihw.shape[0]
    Cin_p = _round_up(Cin, LANE)
    Cout_p = _round_up(Cout, LANE)
    # TN=256 fills the 256-wide MXU on v6e/v7x when Cout allows; 128 otherwise
    # (toy Cout_p=128 -> TN=128, which is also the right choice for v5e).
    TN = 256 if Cout_p % 256 == 0 else 128

    # Row tile: TH image rows -> TM = TH*W flattened pixels. TM targets ~128
    # since the accumulator lives in vregs (TM*TN*4 bytes of register file).
    TH = max(1, min(H, max(1, 128 // W)))
    while H % TH:
        TH -= 1
    TM = TH * W
    # TODO(synk): W not a multiple of 8 (e.g. PSPNet W=60/97) needs masked
    # flattening of (TH, W) into the sublane dim; unsupported here.
    assert W % 8 == 0 and TM % 8 == 0, "W and TH*W must be sublane-aligned"

    # Fold BN scale into the conv weights; shift stays as the only epilogue vector.
    w_folded = w_oihw * scale[:, None, None, None]                        # OIHW
    wk = jnp.transpose(w_folded, (2, 3, 1, 0)).reshape(9, Cin, Cout)      # (tap, Cin, Cout)
    wk = jnp.pad(wk, ((0, 0), (0, Cin_p - Cin), (0, Cout_p - Cout))).astype(jnp.bfloat16)
    shift_p = jnp.pad(shift, (0, Cout_p - Cout)).reshape(1, Cout_p).astype(jnp.float32)

    # Single zero-padded NHWC activation in HBM (no 9x im2col copy), bf16 for the MXU.
    # TODO(synk): the host-side pad materializes one extra activation copy in HBM;
    # a masked-border kernel would remove it entirely.
    xp = jnp.pad(cat_nhwc.astype(jnp.bfloat16),
                 ((0, 0), (1, 1), (1, 1), (0, Cin_p - Cin)))              # (N, H+2, W+2, Cin_p)

    # VMEM budgeting: single-buffer the resident image when double-buffering it
    # would consume a big chunk of VMEM (required on v7x at real channel counts),
    # and derive vmem_limit_bytes from the actual tile footprint.
    vmem_cap = _tpu_vmem_capacity_bytes()
    img_bytes = (H + 2) * (W + 2) * Cin_p * 2
    w_bytes = 9 * Cin_p * TN * 2
    out_bytes = TM * TN * 2
    shift_bytes = TN * 4
    img_single = 2 * img_bytes > vmem_cap // 4
    img_kwargs = {"pipeline_mode": pl.Buffered(1)} if img_single else {}
    footprint = img_bytes * (1 if img_single else 2) + 2 * (w_bytes + out_bytes + shift_bytes)
    vmem_limit = max(16 << 20,
                     min(int(footprint * 1.5) + (4 << 20),
                         min(100 << 20, vmem_cap - (8 << 20))))
    # TODO(synk): at production channel counts (Cin~4096) on v7x (64 MiB VMEM) a
    # Cin-tiled reduction grid axis is required; whole-Cin residency assumed here.

    kernel = _make_bottleneck_kernel(H, W, TH, Cin_p, TN)
    # Row tiles innermost -> weight / shift block index constant across them
    # (no per-step weight re-DMA); the padded image depends only on n.
    grid = (N, Cout_p // TN, H // TH)

    out = pl.pallas_call(
        kernel,
        out_shape=jax.ShapeDtypeStruct((N, H * W, Cout_p), jnp.bfloat16),
        grid_spec=pltpu.PrefetchScalarGridSpec(
            num_scalar_prefetch=0,
            grid=grid,
            in_specs=[
                # padded image: one DMA per batch element, resident across (j, m)
                pl.BlockSpec((1, H + 2, W + 2, Cin_p),
                             lambda n, j, m: (n, 0, 0, 0), **img_kwargs),
                # scale-folded weights: resident across row tiles
                pl.BlockSpec((9, Cin_p, TN), lambda n, j, m: (0, 0, j)),
                pl.BlockSpec((1, TN), lambda n, j, m: (0, j)),
            ],
            out_specs=pl.BlockSpec((1, TM, TN), lambda n, j, m: (n, m, j)),
        ),
        compiler_params=pltpu.CompilerParams(
            dimension_semantics=("parallel", "parallel", "parallel"),
            vmem_limit_bytes=vmem_limit,
        ),
    )(xp, wk, shift_p)

    out = out[:, :, :Cout].astype(jnp.float32).reshape(N, H, W, Cout)
    return jnp.transpose(out, (0, 3, 1, 2))        # NCHW, module interface


# Pure-JAX reference for the same fused bottleneck op (same bf16-rounded operands,
# f32 output -- the kernel additionally rounds its output to bf16).
def bottleneck_ref(cat_nhwc, w_oihw, scale, shift):
    w_folded = w_oihw * scale[:, None, None, None]
    x = cat_nhwc.astype(jnp.bfloat16).astype(jnp.float32)
    w_hwio = jnp.transpose(w_folded, (2, 3, 1, 0)).astype(jnp.bfloat16).astype(jnp.float32)
    y = lax.conv_general_dilated(
        x, w_hwio, window_strides=(1, 1), padding=((1, 1), (1, 1)),
        dimension_numbers=('NHWC', 'HWIO', 'NHWC'))
    y = y + shift[None, None, None, :]
    y = _leaky_relu(y)
    return jnp.transpose(y, (0, 3, 1, 2))


# ----------------------------------------------------------------------------
# PSPModule parameters + forward (NHWC internally)
# ----------------------------------------------------------------------------
def init_psp_params(key, features, out_features, sizes):
    params = {"stages": []}
    for _ in sizes:
        key, k1, k2, k3, k4, k5 = jax.random.split(key, 6)
        params["stages"].append(dict(
            w=0.1 * jax.random.normal(k1, (out_features, features), jnp.float32),
            gamma=1.0 + 0.1 * jax.random.normal(k2, (out_features,), jnp.float32),
            beta=0.1 * jax.random.normal(k3, (out_features,), jnp.float32),
            mean=0.1 * jax.random.normal(k4, (out_features,), jnp.float32),
            var=0.5 + 0.5 * jnp.abs(jax.random.normal(k5, (out_features,), jnp.float32)),
        ))
    cin_total = features + len(sizes) * out_features
    key, k1, k2, k3, k4, k5 = jax.random.split(key, 6)
    params["bottleneck"] = dict(
        w=0.05 * jax.random.normal(k1, (out_features, cin_total, 3, 3), jnp.float32),
        gamma=1.0 + 0.1 * jax.random.normal(k2, (out_features,), jnp.float32),
        beta=0.1 * jax.random.normal(k3, (out_features,), jnp.float32),
        mean=0.1 * jax.random.normal(k4, (out_features,), jnp.float32),
        var=0.5 + 0.5 * jnp.abs(jax.random.normal(k5, (out_features,), jnp.float32)),
    )
    return params


def psp_forward(params, feats_nchw, sizes, bottleneck_fn):
    N, C, H, W = feats_nchw.shape
    feats = jnp.transpose(feats_nchw, (0, 2, 3, 1))                      # NHWC once
    priors = []
    for s, sp in zip(sizes, params["stages"]):
        # stage = AdaptiveAvgPool2d(s) -> 1x1 conv -> BN + LeakyReLU -> bilinear up
        Ph = _adaptive_pool_matrix(H, s)
        Pw = _adaptive_pool_matrix(W, s)
        pooled = jnp.einsum('sh,nhwc,tw->nstc', Ph, feats, Pw)           # (N, s, s, C)
        y = jnp.einsum('nstc,oc->nsto', pooled, sp["w"])                 # 1x1 conv
        scale, shift = _bn_scale_shift(sp["gamma"], sp["beta"], sp["mean"], sp["var"])
        y = _leaky_relu(y * scale + shift)
        Uh = _bilinear_matrix(H, s)
        Uw = _bilinear_matrix(W, s)
        priors.append(jnp.einsum('Hs,nsto,Wt->nHWo', Uh, y, Uw))         # align_corners=True
    cat = jnp.concatenate(priors + [feats], axis=-1)                     # stages first, then feats
    bp = params["bottleneck"]
    scale, shift = _bn_scale_shift(bp["gamma"], bp["beta"], bp["mean"], bp["var"])
    return bottleneck_fn(cat, bp["w"], scale, shift)


if __name__ == "__main__":
    N, C, H, W = 2, 4, 16, 16
    OUT_FEATURES = 8
    SIZES = (1, 2, 3, 6)

    key = jax.random.PRNGKey(0)
    key, kx, kp = jax.random.split(key, 3)
    feats = jax.random.normal(kx, (N, C, H, W), jnp.float32)
    params = init_psp_params(kp, C, OUT_FEATURES, SIZES)

    out = psp_forward(params, feats, SIZES, bottleneck_conv3x3_bn_lrelu)
    out = jax.block_until_ready(out)
    assert out.shape == (N, OUT_FEATURES, H, W), out.shape

    ref = psp_forward(params, feats, SIZES, bottleneck_ref)
    ref = jax.block_until_ready(ref)
    # Kernel emits bf16 (per perf review), reference is f32: compare with a
    # bf16-appropriate mixed relative/absolute tolerance.
    err = float(jnp.max(jnp.abs(out - ref) / (1.0 + jnp.abs(ref))))
    assert err < 1e-2, f"max rel error vs reference: {err}"

    print("KERNEL_OK")
</pallas_src>

<mosaic_0001>
module attributes {stable_mosaic.version = 11 : i64} {
  func.func @kernel(%arg0: i32, %arg1: i32, %arg2: i32, %arg3: memref<1x18x18x128xbf16, #tpu.memory_space<vmem>>, %arg4: memref<9x128x128xbf16, #tpu.memory_space<vmem>>, %arg5: memref<1x128xf32, #tpu.memory_space<vmem>>, %arg6: memref<1x128x128xbf16, #tpu.memory_space<vmem>>) attributes {dimension_semantics = [#tpu.dimension_semantics<parallel>, #tpu.dimension_semantics<parallel>, #tpu.dimension_semantics<parallel>], iteration_bounds = array<i64: 2, 1, 2>, scalar_prefetch = 0 : i64, scratch_operands = 0 : i64, tpu.core_type = #tpu.core_type<tc>, window_params = [{transform_indices = @transform_0, window_bounds = array<i64: 1, 18, 18, 128>}, {transform_indices = @transform_1, window_bounds = array<i64: 9, 128, 128>}, {transform_indices = @transform_2, window_bounds = array<i64: 1, 128>}, {transform_indices = @transform_3, window_bounds = array<i64: 1, 128, 128>}]} {
    %c8_i32 = arith.constant 8 : i32
    %0 = arith.muli %arg2, %c8_i32 : i32
    %1 = tpu.assume_multiple %0, 8 : i32
    %cst = arith.constant 0.000000e+00 : f32
    %2 = vector.broadcast %cst : f32 to vector<128x128xf32>
    %c0 = arith.constant 0 : index
    %3 = arith.index_cast %1 : i32 to index
    %c0_0 = arith.constant 0 : index
    %c0_1 = arith.constant 0 : index
    %4 = vector.load %arg3[%c0, %3, %c0_0, %c0_1] : memref<1x18x18x128xbf16, #tpu.memory_space<vmem>>, vector<1x10x16x128xbf16>
    %5 = vector.shape_cast %4 : vector<1x10x16x128xbf16> to vector<10x16x128xbf16>
    %6 = vector.extract_strided_slice %5 {offsets = [0, 0, 0], sizes = [8, 16, 128], strides = [1, 1, 1]} : vector<10x16x128xbf16> to vector<8x16x128xbf16>
    %7 = vector.shape_cast %6 : vector<8x16x128xbf16> to vector<128x128xbf16>
    %c0_2 = arith.constant 0 : index
    %c0_3 = arith.constant 0 : index
    %c0_4 = arith.constant 0 : index
    %8 = vector.load %arg4[%c0_2, %c0_3, %c0_4] : memref<9x128x128xbf16, #tpu.memory_space<vmem>>, vector<1x128x128xbf16>
    %9 = vector.shape_cast %8 : vector<1x128x128xbf16> to vector<128x128xbf16>
    %cst_5 = arith.constant dense<0.000000e+00> : vector<128x128xf32>
    %10 = tpu.matmul %7, %9, %cst_5 {dimension_numbers = #tpu.dot_dimension_numbers<[1], [0], [0], [1], [0, 0, 1, 1], [], []>} : vector<128x128xbf16>, vector<128x128xbf16>, vector<128x128xf32> -> vector<128x128xf32>
    %11 = arith.addf %2, %10 : vector<128x128xf32>
    %12 = vector.extract_strided_slice %5 {offsets = [1, 0, 0], sizes = [8, 16, 128], strides = [1, 1, 1]} : vector<10x16x128xbf16> to vector<8x16x128xbf16>
    %13 = vector.shape_cast %12 : vector<8x16x128xbf16> to vector<128x128xbf16>
    %c3 = arith.constant 3 : index
    %c0_6 = arith.constant 0 : index
    %c0_7 = arith.constant 0 : index
    %14 = vector.load %arg4[%c3, %c0_6, %c0_7] : memref<9x128x128xbf16, #tpu.memory_space<vmem>>, vector<1x128x128xbf16>
    %15 = vector.shape_cast %14 : vector<1x128x128xbf16> to vector<128x128xbf16>
    %cst_8 = arith.constant dense<0.000000e+00> : vector<128x128xf32>
    %16 = tpu.matmul %13, %15, %cst_8 {dimension_numbers = #tpu.dot_dimension_numbers<[1], [0], [0], [1], [0, 0, 1, 1], [], []>} : vector<128x128xbf16>, vector<128x128xbf16>, vector<128x128xf32> -> vector<128x128xf32>
    %17 = arith.addf %11, %16 : vector<128x128xf32>
    %18 = vector.extract_strided_slice %5 {offsets = [2, 0, 0], sizes = [8, 16, 128], strides = [1, 1, 1]} : vector<10x16x128xbf16> to vector<8x16x128xbf16>
    %19 = vector.shape_cast %18 : vector<8x16x128xbf16> to vector<128x128xbf16>
    %c6 = arith.constant 6 : index
    %c0_9 = arith.constant 0 : index
    %c0_10 = arith.constant 0 : index
    %20 = vector.load %arg4[%c6, %c0_9, %c0_10] : memref<9x128x128xbf16, #tpu.memory_space<vmem>>, vector<1x128x128xbf16>
    %21 = vector.shape_cast %20 : vector<1x128x128xbf16> to vector<128x128xbf16>
    %cst_11 = arith.constant dense<0.000000e+00> : vector<128x128xf32>
    %22 = tpu.matmul %19, %21, %cst_11 {dimension_numbers = #tpu.dot_dimension_numbers<[1], [0], [0], [1], [0, 0, 1, 1], [], []>} : vector<128x128xbf16>, vector<128x128xbf16>, vector<128x128xf32> -> vector<128x128xf32>
    %23 = arith.addf %17, %22 : vector<128x128xf32>
    %c0_12 = arith.constant 0 : index
    %24 = arith.index_cast %1 : i32 to index
    %c1 = arith.constant 1 : index
    %c0_13 = arith.constant 0 : index
    %25 = vector.load %arg3[%c0_12, %24, %c1, %c0_13] : memref<1x18x18x128xbf16, #tpu.memory_space<vmem>>, vector<1x10x16x128xbf16>
    %26 = vector.shape_cast %25 : vector<1x10x16x128xbf16> to vector<10x16x128xbf16>
    %27 = vector.extract_strided_slice %26 {offsets = [0, 0, 0], sizes = [8, 16, 128], strides = [1, 1, 1]} : vector<10x16x128xbf16> to vector<8x16x128xbf16>
    %28 = vector.shape_cast %27 : vector<8x16x128xbf16> to vector<128x128xbf16>
    %c1_14 = arith.constant 1 : index
    %c0_15 = arith.constant 0 : index
    %c0_16 = arith.constant 0 : index
    %29 = vector.load %arg4[%c1_14, %c0_15, %c0_16] : memref<9x128x128xbf16, #tpu.memory_space<vmem>>, vector<1x128x128xbf16>
    %30 = vector.shape_cast %29 : vector<1x128x128xbf16> to vector<128x128xbf16>
    %cst_17 = arith.constant dense<0.000000e+00> : vector<128x128xf32>
    %31 = tpu.matmul %28, %30, %cst_17 {dimension_numbers = #tpu.dot_dimension_numbers<[1], [0], [0], [1], [0, 0, 1, 1], [], []>} : vector<128x128xbf16>, vector<128x128xbf16>, vector<128x128xf32> -> vector<128x128xf32>
    %32 = arith.addf %23, %31 : vector<128x128xf32>
    %33 = vector.extract_strided_slice %26 {offsets = [1, 0, 0], sizes = [8, 16, 128], strides = [1, 1, 1]} : vector<10x16x128xbf16> to vector<8x16x128xbf16>
    %34 = vector.shape_cast %33 : vector<8x16x128xbf16> to vector<128x128xbf16>
    %c4 = arith.constant 4 : index
    %c0_18 = arith.constant 0 : index
    %c0_19 = arith.constant 0 : index
    %35 = vector.load %arg4[%c4, %c0_18, %c0_19] : memref<9x128x128xbf16, #tpu.memory_space<vmem>>, vector<1x128x128xbf16>
    %36 = vector.shape_cast %35 : vector<1x128x128xbf16> to vector<128x128xbf16>
    %cst_20 = arith.constant dense<0.000000e+00> : vector<128x128xf32>
    %37 = tpu.matmul %34, %36, %cst_20 {dimension_numbers = #tpu.dot_dimension_numbers<[1], [0], [0], [1], [0, 0, 1, 1], [], []>} : vector<128x128xbf16>, vector<128x128xbf16>, vector<128x128xf32> -> vector<128x128xf32>
    %38 = arith.addf %32, %37 : vector<128x128xf32>
    %39 = vector.extract_strided_slice %26 {offsets = [2, 0, 0], sizes = [8, 16, 128], strides = [1, 1, 1]} : vector<10x16x128xbf16> to vector<8x16x128xbf16>
    %40 = vector.shape_cast %39 : vector<8x16x128xbf16> to vector<128x128xbf16>
    %c7 = arith.constant 7 : index
    %c0_21 = arith.constant 0 : index
    %c0_22 = arith.constant 0 : index
    %41 = vector.load %arg4[%c7, %c0_21, %c0_22] : memref<9x128x128xbf16, #tpu.memory_space<vmem>>, vector<1x128x128xbf16>
    %42 = vector.shape_cast %41 : vector<1x128x128xbf16> to vector<128x128xbf16>
    %cst_23 = arith.constant dense<0.000000e+00> : vector<128x128xf32>
    %43 = tpu.matmul %40, %42, %cst_23 {dimension_numbers = #tpu.dot_dimension_numbers<[1], [0], [0], [1], [0, 0, 1, 1], [], []>} : vector<128x128xbf16>, vector<128x128xbf16>, vector<128x128xf32> -> vector<128x128xf32>
    %44 = arith.addf %38, %43 : vector<128x128xf32>
    %c0_24 = arith.constant 0 : index
    %45 = arith.index_cast %1 : i32 to index
    %c2 = arith.constant 2 : index
    %c0_25 = arith.constant 0 : index
    %46 = vector.load %arg3[%c0_24, %45, %c2, %c0_25] : memref<1x18x18x128xbf16, #tpu.memory_space<vmem>>, vector<1x10x16x128xbf16>
    %47 = vector.shape_cast %46 : vector<1x10x16x128xbf16> to vector<10x16x128xbf16>
    %48 = vector.extract_strided_slice %47 {offsets = [0, 0, 0], sizes = [8, 16, 128], strides = [1, 1, 1]} : vector<10x16x128xbf16> to vector<8x16x128xbf16>
    %49 = vector.shape_cast %48 : vector<8x16x128xbf16> to vector<128x128xbf16>
    %c2_26 = arith.constant 2 : index
    %c0_27 = arith.constant 0 : index
    %c0_28 = arith.constant 0 : index
    %50 = vector.load %arg4[%c2_26, %c0_27, %c0_28] : memref<9x128x128xbf16, #tpu.memory_space<vmem>>, vector<1x128x128xbf16>
    %51 = vector.shape_cast %50 : vector<1x128x128xbf16> to vector<128x128xbf16>
    %cst_29 = arith.constant dense<0.000000e+00> : vector<128x128xf32>
    %52 = tpu.matmul %49, %51, %cst_29 {dimension_numbers = #tpu.dot_dimension_numbers<[1], [0], [0], [1], [0, 0, 1, 1], [], []>} : vector<128x128xbf16>, vector<128x128xbf16>, vector<128x128xf32> -> vector<128x128xf32>
    %53 = arith.addf %44, %52 : vector<128x128xf32>
    %54 = vector.extract_strided_slice %47 {offsets = [1, 0, 0], sizes = [8, 16, 128], strides = [1, 1, 1]} : vector<10x16x128xbf16> to vector<8x16x128xbf16>
    %55 = vector.shape_cast %54 : vector<8x16x128xbf16> to vector<128x128xbf16>
    %c5 = arith.constant 5 : index
    %c0_30 = arith.constant 0 : index
    %c0_31 = arith.constant 0 : index
    %56 = vector.load %arg4[%c5, %c0_30, %c0_31] : memref<9x128x128xbf16, #tpu.memory_space<vmem>>, vector<1x128x128xbf16>
    %57 = vector.shape_cast %56 : vector<1x128x128xbf16> to vector<128x128xbf16>
    %cst_32 = arith.constant dense<0.000000e+00> : vector<128x128xf32>
    %58 = tpu.matmul %55, %57, %cst_32 {dimension_numbers = #tpu.dot_dimension_numbers<[1], [0], [0], [1], [0, 0, 1, 1], [], []>} : vector<128x128xbf16>, vector<128x128xbf16>, vector<128x128xf32> -> vector<128x128xf32>
    %59 = arith.addf %53, %58 : vector<128x128xf32>
    %60 = vector.extract_strided_slice %47 {offsets = [2, 0, 0], sizes = [8, 16, 128], strides = [1, 1, 1]} : vector<10x16x128xbf16> to vector<8x16x128xbf16>
    %61 = vector.shape_cast %60 : vector<8x16x128xbf16> to vector<128x128xbf16>
    %c8 = arith.constant 8 : index
    %c0_33 = arith.constant 0 : index
    %c0_34 = arith.constant 0 : index
    %62 = vector.load %arg4[%c8, %c0_33, %c0_34] : memref<9x128x128xbf16, #tpu.memory_space<vmem>>, vector<1x128x128xbf16>
    %63 = vector.shape_cast %62 : vector<1x128x128xbf16> to vector<128x128xbf16>
    %cst_35 = arith.constant dense<0.000000e+00> : vector<128x128xf32>
    %64 = tpu.matmul %61, %63, %cst_35 {dimension_numbers = #tpu.dot_dimension_numbers<[1], [0], [0], [1], [0, 0, 1, 1], [], []>} : vector<128x128xbf16>, vector<128x128xbf16>, vector<128x128xf32> -> vector<128x128xf32>
    %65 = arith.addf %59, %64 : vector<128x128xf32>
    %c0_36 = arith.constant 0 : index
    %c0_37 = arith.constant 0 : index
    %66 = vector.load %arg5[%c0_36, %c0_37] : memref<1x128xf32, #tpu.memory_space<vmem>>, vector<1x128xf32>
    %67 = vector.broadcast %66 : vector<1x128xf32> to vector<128x128xf32>
    %68 = arith.addf %65, %67 : vector<128x128xf32>
    %cst_38 = arith.constant 0.000000e+00 : f32
    %69 = vector.broadcast %cst_38 : f32 to vector<128x128xf32>
    %70 = arith.cmpf oge, %68, %69 : vector<128x128xf32>
    %cst_39 = arith.constant 0.00999999977 : f32
    %71 = vector.broadcast %cst_39 : f32 to vector<128x128xf32>
    %72 = arith.mulf %71, %68 : vector<128x128xf32>
    %73 = arith.select %70, %68, %72 : vector<128x128xi1>, vector<128x128xf32>
    %74 = arith.truncf %73 : vector<128x128xf32> to vector<128x128xbf16>
    %c0_40 = arith.constant 0 : index
    %c0_41 = arith.constant 0 : index
    %c0_42 = arith.constant 0 : index
    %75 = vector.load %arg6[%c0_40, %c0_41, %c0_42] : memref<1x128x128xbf16, #tpu.memory_space<vmem>>, vector<1x128x128xbf16>
    %76 = vector.shape_cast %75 : vector<1x128x128xbf16> to vector<128x128xbf16>
    %77 = vector.shape_cast %74 : vector<128x128xbf16> to vector<1x128x128xbf16>
    tpu.vector_store %arg6[%c0_40, %c0_41, %c0_42], %77 {strides = array<i32>} : memref<1x128x128xbf16, #tpu.memory_space<vmem>>, vector<1x128x128xbf16>,
    return
  }
  func.func @transform_0(%arg0: i32, %arg1: i32, %arg2: i32) -> (i32, i32, i32, i32) {
    %c0_i32 = arith.constant 0 : i32
    %c0_i32_0 = arith.constant 0 : i32
    %c0_i32_1 = arith.constant 0 : i32
    %c0_i32_2 = arith.constant 0 : i32
    return %arg0, %c0_i32, %c0_i32_0, %c0_i32_1 : i32, i32, i32, i32
  }
  func.func @transform_1(%arg0: i32, %arg1: i32, %arg2: i32) -> (i32, i32, i32) {
    %c0_i32 = arith.constant 0 : i32
    %c0_i32_0 = arith.constant 0 : i32
    %c0_i32_1 = arith.constant 0 : i32
    return %c0_i32, %c0_i32_0, %arg1 : i32, i32, i32
  }
  func.func @transform_2(%arg0: i32, %arg1: i32, %arg2: i32) -> (i32, i32) {
    %c0_i32 = arith.constant 0 : i32
    %c0_i32_0 = arith.constant 0 : i32
    return %c0_i32, %arg1 : i32, i32
  }
  func.func @transform_3(%arg0: i32, %arg1: i32, %arg2: i32) -> (i32, i32, i32) {
    %c0_i32 = arith.constant 0 : i32
    return %arg0, %arg2, %arg1 : i32, i32, i32
  }
}

</mosaic_0001>

<bundles_post_ra>
// kernel: tpu_custom_call.1
= control target key start
LH: loop header
LB: loop body
LE: loop exit
PB: predicated region body
PF: predicated region fallthrough
CT: control target
= control target key end

     0   :  { %8 = vsyncpa [#allocation3], 0  ;;  %s4634_s0 = inlined_call_operand.vmem [shape: bf16[2,18,18,128], index: 0, kind: input, shape index: {}]   ;;  %s4635_s1 = inlined_call_operand.vmem [shape: bf16[9,128,128], index: 1, kind: input, shape index: {}]   ;;  %s4636_s2 = inlined_call_operand.vmem [shape: f32[1,128], index: 2, kind: input, shape index: {}]   ;;  %s4637_s3 = inlined_call_operand.hbm [shape: bf16[2,256,128], index: 3, kind: output, shape index: {}]  }
   0x1   :  { %10 = vsyncpa [#allocation3 + $0x1], 0  ;;  %s3811_s12 = smov 0   ;;  %s3813_s13 = smov 0  }
   0x2   :  { %s3815_s14 = smov 0   ;;  %s3817_s15 = smov 0  }
   0x3   :  { %s3819_s16 = smov 0   ;;  %s3821_s17 = smov 0  }
   0x4   :  { %s3823_s18 = smov 0   ;;  %s3825_s19 = smov 0  }
   0x5 LB: > { %s2621_s20 = sadd.s32 4294967295, %s3786_s19   ;;  %s2622_s21 = sadd.s32 4294967294, %s3786_s19   ;;  %s3786_s19 = sphi %s3825_s19, %s16_s19   ;;  %s3782_s18 = sphi %s3823_s18, %s4650_s18   ;;  %s3778_s17 = sphi %s3821_s17, %s4649_s17   ;;  %s3774_s16 = sphi %s3819_s16, %s4648_s16   ;;  %s3770_s15 = sphi %s3817_s15, %s4647_s15   ;;  %s3766_s14 = sphi %s3815_s14, %s4646_s14   ;;  %s3762_s13 = sphi %s3813_s13, %s4645_s13   ;;  %s3758_s12 = sphi %s3811_s12, %s4644_s12  }
   0x6   : > { %s28_s22 = sadd.s32 1, %s3778_s17  ;;  %s35_s23 = sadd.s32 1, %s3782_s18 }
   0x7   : > { %p29_p0 = scmp.ge.s32.totalorder %s28_s22, 2  ;;  %p134_p1 = scmp.ne.s32.totalorder %s3766_s14, %s3762_s13 }
   0x8   : > { %p135_p2 = scmp.eq.s32.totalorder %s2621_s20, 3  ;;  %p140_p5 = scmp.ne.s32.totalorder %s3762_s13, %s3758_s12 }
   0x9   : > { %s4652_s22 = smov (%p29_p0, %s28_s22), 0  ;;  %s4654_s23 = smov (!%p29_p0, %s35_s23), %s3782_s18 }
   0xa   : > { %s118_s24 = ssub.s32 %s3778_s17, %s4652_s22  ;;  %p3862_p3 = por %p135_p2, %p134_p1 }
   0xb   : > { %p37_p4 = scmp.ge.s32.totalorder %s4654_s23, 2  ;;  %p141_p6 = scmp.eq.s32.totalorder %s2622_s21, 3 }
   0xc   : > { %p2627_p7 = scmp.ge.s32.totalorder %s3786_s19, 1  ;;  %p180_p9 = scmp.lt.s32.totalorder %s3786_s19, 5 }
   0xd   : > { %s4656_s23 = smov (%p37_p4, %s4654_s23), 0  ;;  %p3871_p8 = por %p141_p6, %p140_p5 }
   0xe   : > { %s117_s27 = ssub.s32 %s3782_s18, %s4656_s23  ;;  %s124_s28 = sadd.s32 1, %s3766_s14 }
   0xf   : > { %s119_s29 = sor.u32 %s118_s24, %s117_s27  ;;  %p181_p10 = pnand %p2627_p7, %p180_p9 }
  0x10   : > { %p122_p11 = scmp.eq.s32.totalorder %s119_s29, 0  ;;  %v3610_v0 = vld [vmem:[%s4635_s1 + $0xc0] sm:$0xff] (!%p181_p10)   ;;  %p211_p12 = scmp.lt.s32.totalorder (!%p181_p10), %s3774_s16, 1  ;;  %v3612_v2 = vld [vmem:[%s4635_s1 + $0xc8] sm:$0xff] (!%p181_p10)   ;;  %v3614_v4 = vld [vmem:[%s4635_s1 + $0xd0] sm:$0xff] (!%p181_p10)   ;;  %vm1691_vm0 = vcmask (!%p181_p10), 1042432  }
  0x11   : > { %184 = sbr.rel (%p181_p10) target bundleno = 436 (0x1b4), region = 32  ;;  %v3611_v1 = vld [vmem:[%s4635_s1 + $0x100] sm:$0xff] (!%p181_p10)   ;;  %3104 = vmatprep.subr.bf16.mxu1 (!%p181_p10), %v3610_v0  ;;  %v3613_v3 = vld [vmem:[%s4635_s1 + $0x108] sm:$0xff] (!%p181_p10)   ;;  %v3615_v5 = vld [vmem:[%s4635_s1 + $0x110] sm:$0xff] (!%p181_p10)   ;;  %vm1692_vm1 = vcmask (!%p181_p10), 1046532   ;;  %s208_s10 = sand.u32 (!%p181_p10), 1, %s3762_s13  }
  0x12   : > { %s3880_s30 = scalar_select %p122_p11, %s3766_s14, %s124_s28  }
  0x13   : > { %3232 = vmatprep.subr.bf16.mxu0 (!%p181_p10), %v3611_v1  ;;  %3105 = vmatpush3.bf16.msra.mxu1 (!%p181_p10), %v3610_v0  ;;  %v3616_v6 = vld [vmem:[%s4635_s1 + $0xd8] sm:$0xff] (!%p181_p10)   ;;  %s2896_s8 = smul.u32 (!%p181_p10), 96, %s3770_s15  ;;  %v3618_v8 = vld [vmem:[%s4635_s1 + $0xe0] sm:$0xff] (!%p181_p10)   ;;  %v3620_v10 = vld [vmem:[%s4635_s1 + $0xe8] sm:$0xff] (!%p181_p10)   ;;  %vm840_vm2 = vsmask.f32 (!%p181_p10), 3328 }
  0x14   : > { %3233 = vmatpush3.bf16.msra.mxu0 (!%p181_p10), %v3611_v1  ;;  %3106 = vmatprep.subr.bf16.mxu1 (!%p181_p10), %v3612_v2  ;;  %v3617_v7 = vld [vmem:[%s4635_s1 + $0x118] sm:$0xff] (!%p181_p10)   ;;  %v3619_v9 = vld [vmem:[%s4635_s1 + $0x120] sm:$0xff] (!%p181_p10)   ;;  %v3621_v11 = vld [vmem:[%s4635_s1 + $0x128] sm:$0xff] (!%p181_p10)   ;;  %vm841_vm3 = vsmask.f32 (!%p181_p10), 7440  ;;  %s2891_s21 = sshll.u32 (!%p181_p10), %s3770_s15, 4 }
  0x15   : > { %3234 = vmatprep.subr.bf16.mxu0 (!%p181_p10), %v3613_v3  ;;  %v3622_v22 = vld [vmem:[%s4635_s1 + $0xf0] sm:$0xff] (!%p181_p10)   ;;  %vm3943_vm4 = vmor (!%p181_p10), %vm1691_vm0, %vm1692_vm1  ;;  %v3624_v31 = vld [vmem:[%s4635_s1 + $0xf8] sm:$0xff] (!%p181_p10)   ;;  %s2892_s24 = sshll.u32 (!%p181_p10), %s3774_s16, 5  ;;  %s3788_s7 = smov (!%p181_p10), [#allocation2]  }
  0x16   : > { %v3623_v27 = vld [vmem:[%s4635_s1 + $0x130] sm:$0xff] (!%p181_p10)   ;;  %vm3958_vm5 = vmor (!%p181_p10), %vm840_vm2, %vm841_vm3  ;;  %v3625_v46 = vld [vmem:[%s4635_s1 + $0x138] sm:$0xff] (!%p181_p10)   ;;  %s2509_s15 = sadd.s32 (!%p181_p10), %s2892_s24, %s2891_s21 }
  0x17   : > { %3107 = vmatpush3.bf16.msra.mxu1 (!%p181_p10), %v3612_v2  ;;  %v3628_v57 = vld [vmem:[%s4635_s1] sm:$0xff] (!%p181_p10)   ;;  %v3630_v1 = vld [vmem:[%s4635_s1 + $0x8] sm:$0xff] (!%p181_p10)  }
  0x18   : > { %s212_s20 = scalar_select %p211_p12, %s3774_s16, 1  ;;  %3235 = vmatpush3.bf16.msra.mxu0 %v3613_v3  ;;  %3108 = vmatprep.subr.bf16.mxu1 %v3614_v4  ;;  %v3629_v61 = vld [vmem:[%s4635_s1 + $0x1c0] sm:$0xff]   ;;  %v3678_v35 = vld [vmem:[%s4635_s1 + $0x168] sm:$0xff]  }
  0x19   : > { %3236 = vmatprep.subr.bf16.mxu0 %v3615_v5  ;;  %s2893_s16 = sshll.u32 %s2509_s15, 6 }
  0x1a   : > { %s3536_s29 = smul.u32 216, %s212_s20  ;;  %s4574_s4 = scalar_lea.hbm %s4637_s3, %s2893_s16 }
  0x1b   : > { %3109 = vmatpush3.bf16.msra.mxu1 %v3614_v4 }
  0x1c   : > { %s215_s11 = scalar_lea.vmem %s4634_s0, %s3536_s29  ;;  %3237 = vmatpush3.bf16.msra.mxu0 %v3615_v5  ;;  %3110 = vmatprep.subr.bf16.mxu1 %v3616_v6  ;;  %s4582_s29 = scalar_lea.sflag [#allocation3], %s208_s10 }
  0x1d   : > { %3238 = vmatprep.subr.bf16.mxu0 %v3617_v7  ;;  %s3921_s5 = scalar_lea.vmem %s215_s11, %s2896_s8  ;;  %s2628_s11 = sshll.u32 %s208_s10, 6 }
  0x1e   : > { %v3927_v12 = vld [vmem:[%s3921_s5 + $0xc] sm:$0xff]   ;;  %v815_v15 = vld [vmem:[%s3921_s5 + $0x14] sm:$0x1]  ;;  %v816_v34 = vld [vmem:[%s3921_s5 + $0x18] sm:$0xf]  ;;  %s4540_s20 = scalar_lea.vmem [#allocation2], %s2628_s11 }
  0x1f   : > { %3111 = vmatpush3.bf16.msra.mxu1 %v3616_v6  ;;  %v813_v13 = vld [vmem:[%s3921_s5 + $0xc] sm:$0xf]  ;;  %v3931_v14 = vld [vmem:[%s3921_s5 + $0x10] sm:$0xf]  ;;  %3120 = vmatprep.mubr.bf16.mxu1 %v3927_v12  ;;  %v887_v20 = vshll.u32 %v815_v15, 16  ;;  %v1706_v25 = vrot.slane %v815_v15, 5 }
  0x20   : > { %3239 = vmatpush3.bf16.msra.mxu0 %v3617_v7  ;;  %3112 = vmatprep.subr.bf16.mxu1 %v3618_v8  ;;  %v868_v16 = vshrl.u32 %v813_v13, 16  ;;  %v871_v17 = vshll.u32 %v813_v13, 16  ;;  %v877_v18 = vshll.u32 %v3931_v14, 16  ;;  %v881_v19 = vshrl.u32 %v3931_v14, 16  ;;  %v3963_v37 = vld [vmem:[%s3921_s5 + $0x1c] sm:$0xf] }
  0x21   : > { %3240 = vmatprep.subr.bf16.mxu0 %v3619_v9  ;;  %v1703_v21 = vrot.slane %v3931_v14, 5  ;;  %v889_v33 = vrot.slane %v887_v20, 5  ;;  %v3966_v38 = vld [vmem:[%s3921_s5 + $0x20] sm:$0x1]  ;;  %v892_v39 = vshrl.u32 %v816_v34, 16  ;;  %v895_v40 = vshll.u32 %v816_v34, 16 }
  0x22   : > { %v870_v23 = vrot.slane %v868_v16, 4  ;;  %v873_v24 = vrot.slane %v871_v17, 5  ;;  %v879_v28 = vrot.slane %v877_v18, 5  ;;  %v883_v29 = vrot.slane %v881_v19, 4  ;;  %v3985_v56 = vld [vmem:[%s3921_s5 + $0x18] sm:$0xff]   ;;  %v4017_v17 = vld [vmem:[%s3921_s5 + $0x24] sm:$0xff]  }
  0x23   : > { %3113 = vmatpush3.bf16.msra.mxu1 %v3618_v8  ;;  %v1705_v30 = vrot.slane %v1703_v21, 4  ;;  %v901_v43 = vshll.u32 %v3963_v37, 16  ;;  %v905_v44 = vshrl.u32 %v3963_v37, 16  ;;  %v911_v45 = vshll.u32 %v3966_v38, 16  ;;  %v819_v62 = vld [vmem:[%s3921_s5 + $0x24] sm:$0xf] }
  0x24   : > { %3241 = vmatpush3.bf16.msra.mxu0 %v3619_v9  ;;  %3114 = vmatprep.subr.bf16.mxu1 %v3620_v10  ;;  %v874_v32 = vor.u32 %v873_v24, %v870_v23  ;;  %v884_v36 = vor.u32 %v883_v29, %v879_v28  ;;  %v894_v48 = vrot.slane %v892_v39, 4  ;;  %v897_v49 = vrot.slane %v895_v40, 5  ;;  %v3995_v63 = vld [vmem:[%s3921_s5 + $0x28] sm:$0xf]  ;;  %v4002_v2 = vld [vmem:[%s3921_s5 + $0x2c] sm:$0x1] }
  0x25   : > { %3242 = vmatprep.subr.bf16.mxu0 %v3621_v11  ;;  %v3970_v41 = vsel %vm3943_vm4, %v1705_v30, %v1706_v25  ;;  %v903_v51 = vrot.slane %v901_v43, 5  ;;  %v907_v52 = vrot.slane %v905_v44, 4  ;;  %v913_v59 = vrot.slane %v911_v45, 5  ;;  %v822_v23 = vld [vmem:[%s3921_s5 + $0x30] sm:$0xf]  ;;  %s2512_s27 = sshll.u32 %s4540_s20, 4  ;;  %s4576_s27 = int_to_ptr.vmem [resolvable:$true] %s2512_s27 }
  0x26   : > { %v875_v42 = vrot.slane %v874_v32, 4  ;;  %v885_v47 = vrot.slane %v884_v36, 4  ;;  %v898_v54 = vor.u32 %v897_v49, %v894_v48  ;;  %v916_v3 = vshrl.u32 %v819_v62, 16  ;;  %v4023_v24 = vld [vmem:[%s3921_s5 + $0x34] sm:$0xf]  ;;  %s3692_s6 = scalar_lea.vmem %s4576_s27, 1024 }
  0x27   : > { %3115 = vmatpush3.bf16.msra.mxu1 %v3620_v10  ;;  %v908_v58 = vor.u32 %v907_v52, %v903_v51  ;;  %v919_v4 = vshll.u32 %v819_v62, 16  ;;  %v925_v5 = vshll.u32 %v3995_v63, 16  ;;  %v929_v7 = vshrl.u32 %v3995_v63, 16  ;;  %v3631_v10 = vld [vmem:[%s4635_s1 + $0x1c8] sm:$0xff]   ;;  %v4026_v25 = vld [vmem:[%s3921_s5 + $0x38] sm:$0x1]  ;;  %p3693_p13 = scmp.ne.s32.totalorder %s4576_s27, %s3692_s6 }
  0x28   : > { %3243 = vmatpush3.bf16.msra.mxu0 %v3621_v11  ;;  %3116 = vmatprep.subr.bf16.mxu1 %v3622_v22  ;;  %v880_v50 = vsel %vm3958_vm5, %v875_v42, %v879_v28  ;;  %v890_v53 = vsel %vm3958_vm5, %v885_v47, %v889_v33  ;;  %v899_v60 = vrot.slane %v898_v54, 4  ;;  %v935_v8 = vshll.u32 %v4002_v2, 16  ;;  %v3634_v28 = vld [vmem:[%s4635_s1 + $0x10] sm:$0xff]   ;;  %v3636_v47 = vld [vmem:[%s4635_s1 + $0x18] sm:$0xff]   ;;  %s3696_s8 = sshll.u32 %s3788_s7, 4  ;;  %s3697_s8 = int_to_ptr.vmem [resolvable:$false] %s3696_s8 }
  0x29   : > { %3244 = vmatprep.subr.bf16.mxu0 %v3623_v27  ;;  %v3982_v55 = vcombine.low %v880_v50, %v890_v53  ;;  %v909_v0 = vrot.slane %v908_v58, 4  ;;  %v918_v11 = vrot.slane %v916_v3, 4  ;;  %v921_v13 = vrot.slane %v919_v4, 5  ;;  %v4034_v33 = vld [vmem:[%s3921_s5 + $0x30] sm:$0xff]   ;;  %v3637_v50 = vld [vmem:[%s4635_s1 + $0x1d8] sm:$0xff]   ;;  %p3694_p0 = pnand %p3693_p13, %p3862_p3  ;;  %s3698_s9 = scalar_lea.vmem %s3697_s8, 2048 }
  0x2a   : > { %v904_v6 = vsel %vm3958_vm5, %v899_v60, %v903_v51  ;;  %v927_v15 = vrot.slane %v925_v5, 5  ;;  %v931_v18 = vrot.slane %v929_v7, 4  ;;  %v937_v19 = vrot.slane %v935_v8, 5  ;;  %v3635_v39 = vld [vmem:[%s4635_s1 + $0x1d0] sm:$0xff]   ;;  %v4055_v54 = vld [vmem:[%s3921_s5 + $0x3c] sm:$0xff]   ;;  %p3699_p2 = scmp.lt.s32.totalorder %s4576_s27, %s3697_s8  ;;  %p3700_p4 = scmp.lt.s32.totalorder %s3698_s9, %s3692_s6 }
  0x2b   : > { %3117 = vmatpush3.bf16.msra.mxu1 %v3622_v22  ;;  %3248 = vmatprep.mubr.bf16.mxu0 %v3982_v55  ;;  %v914_v9 = vsel %vm3958_vm5, %v909_v0, %v913_v59  ;;  %v1710_v20 = vrot.slane %v3963_v37, 5  ;;  %v922_v22 = vor.u32 %v921_v13, %v918_v11  ;;  %v940_v29 = vshrl.u32 %v822_v23, 16  ;;  %v4059_v58 = vld [vmem:[%s3921_s5 + $0x40] sm:$0xf]  ;;  %v4062_v60 = vld [vmem:[%s3921_s5 + $0x44] sm:$0x1]  ;;  %p3695_p1 = pneg %p3694_p0 }
  0x2c   : > { %3245 = vmatpush3.bf16.msra.mxu0 %v3623_v27  ;;  %3118 = vmatprep.subr.bf16.mxu1 %v3624_v31  ;;  %v4014_v16 = vcombine.low %v904_v6, %v914_v9  ;;  %v932_v27 = vor.u32 %v931_v18, %v927_v15  ;;  %v943_v30 = vshll.u32 %v822_v23, 16  ;;  %v953_v34 = vshrl.u32 %v4023_v24, 16  ;;  %v4080_v18 = vld [vmem:[%s3921_s5 + $0x48] sm:$0xff]   ;;  %p3701_p5 = por %p3700_p4, %p3699_p2 }
  0x2d   : > { %3246 = vmatprep.subr.bf16.mxu0 %v3625_v46  ;;  %v923_v32 = vrot.slane %v922_v22, 4  ;;  %v959_v36 = vshll.u32 %v4026_v25, 16  ;;  %v942_v42 = vrot.slane %v940_v29, 4  ;;  %v973_v0 = vshll.u32 %v4059_v58, 16  ;;  %v828_v23 = vld [vmem:[%s3921_s5 + $0x48] sm:$0xf] }
  0x2e   : > { %v933_v40 = vrot.slane %v932_v27, 4  ;;  %v945_v43 = vrot.slane %v943_v30, 5  ;;  %v977_v3 = vshrl.u32 %v4059_v58, 16  ;;  %v983_v4 = vshll.u32 %v4062_v60, 16  ;;  %v4086_v27 = vld [vmem:[%s3921_s5 + $0x4c] sm:$0xf]  ;;  %p3702_p6 = pnand %p3701_p5, %p3695_p1 }
  0x2f   : > { %3119 = vmatpush3.bf16.msra.mxu1 %v3624_v31  ;;  %v949_v31 = vshll.u32 %v4023_v24, 16  ;;  %v928_v45 = vsel %vm3958_vm5, %v923_v32, %v927_v15  ;;  %v961_v53 = vrot.slane %v959_v36, 5  ;;  %v1712_v5 = vrot.slane %v1710_v20, 4 }
  0x30   : > { %3247 = vmatpush3.bf16.msra.mxu0 %v3625_v46  ;;  %3136 = vmatprep.subr.bf16.mxu1 %v3628_v57  ;;  %v955_v46 = vrot.slane %v953_v34, 4  ;;  %v938_v48 = vsel %vm3958_vm5, %v933_v40, %v937_v19  ;;  %v946_v49 = vor.u32 %v945_v43, %v942_v42  ;;  %v975_v9 = vrot.slane %v973_v0, 5  ;;  %v3641_v34 = vld [vmem:[%s4635_s1 + $0x1e0] sm:$0xff]   ;;  %v3642_v42 = vld [vmem:[%s4635_s1 + $0x28] sm:$0xff]   ;;  %v831_v0 = vld [vmem:[%s3921_s5 + $0x54] sm:$0xf] }
  0x31   : > { %3264 = vmatprep.subr.bf16.mxu0 %v3629_v61  ;;  %v951_v44 = vrot.slane %v949_v31, 5  ;;  %v4052_v51 = vcombine.low %v928_v45, %v938_v48  ;;  %v979_v13 = vrot.slane %v977_v3, 4  ;;  %v985_v15 = vrot.slane %v983_v4, 5  ;;  %v4118_v4 = vld [vmem:[%s3921_s5 + $0x58] sm:$0xf] }
  0x32   : > { %3121 = vmatmul.mubr.bf16.vlgmr.msra.gmra.mrb[0].mxu1 %v3985_v56  ;;  %v947_v59 = vrot.slane %v946_v49, 4  ;;  %v988_v30 = vshrl.u32 %v828_v23, 16  ;;  %v991_v31 = vshll.u32 %v828_v23, 16  ;;  %v997_v32 = vshll.u32 %v4086_v27, 16  ;;  %v3646_v23 = vld [vmem:[%s4635_s1 + $0x30] sm:$0xff]  }
  0x33   : > { %3249 = vmatmul.mubr.bf16.vlgmr.msra.gmra.mrb[0].mxu0 %v4014_v16  ;;  %3137 = vmatpush3.bf16.msra.mxu1 %v3628_v57  ;;  %v956_v52 = vor.u32 %v955_v46, %v951_v44  ;;  %v825_v57 = vld [vmem:[%s3921_s5 + $0x3c] sm:$0xf]  ;;  %v980_v29 = vor.u32 %v979_v13, %v975_v9 }
  0x34   : > { %3265 = vmatpush3.bf16.msra.mxu0 %v3629_v61  ;;  %3138 = vmatprep.subr.bf16.mxu1 %v3630_v1  ;;  %v964_v61 = vshrl.u32 %v825_v57, 16  ;;  %v967_v62 = vshll.u32 %v825_v57, 16  ;;  %v952_v6 = vsel %vm3958_vm5, %v947_v59, %v951_v44  ;;  %v990_v44 = vrot.slane %v988_v30, 4 }
  0x35   : > { %3266 = vmatprep.subr.bf16.mxu0 %v3631_v10  ;;  %3124 = vmatprep.mubr.bf16.mxu1 %v4017_v17  ;;  %v981_v43 = vrot.slane %v980_v29, 4  ;;  %v993_v45 = vrot.slane %v991_v31, 5  ;;  %v999_v46 = vrot.slane %v997_v32, 5  ;;  %v1713_v57 = vrot.slane %v3966_v38, 5 }
  0x36   : > { %3252 = vmatprep.mubr.bf16.mxu0 %v4052_v51  ;;  %v966_v7 = vrot.slane %v964_v61, 4  ;;  %v969_v8 = vrot.slane %v967_v62, 5  ;;  %v4113_v62 = vld [vmem:[%s3921_s5 + $0x54] sm:$0xff]  }
  0x37   : > { %3139 = vmatpush3.bf16.msra.mxu1 %v3630_v1  ;;  %v957_v1 = vrot.slane %v956_v52, 4  ;;  %v986_v52 = vsel %vm3958_vm5, %v981_v43, %v985_v15  ;;  %v4125_v38 = vsel %vm3943_vm4, %v1712_v5, %v1713_v57  ;;  %v4135_v5 = vld [vmem:[%s3921_s5 + $0x60] sm:$0xff]   ;;  %v3648_v43 = vld [vmem:[%s4635_s1 + $0x38] sm:$0xff]  }
  0x38   : > { %3267 = vmatpush3.bf16.msra.mxu0 %v3631_v10  ;;  %3140 = vmatprep.subr.bf16.mxu1 %v3634_v28  ;;  %v3640_v10 = vld [vmem:[%s4635_s1 + $0x20] sm:$0xff]   ;;  %v970_v22 = vor.u32 %v969_v8, %v966_v7  ;;  %v1012_v7 = vshrl.u32 %v831_v0, 16 }
  0x39   : > { %3268 = vmatprep.subr.bf16.mxu0 %v3635_v39  ;;  %v962_v11 = vsel %vm3958_vm5, %v957_v1, %v961_v53  ;;  %v3643_v53 = vld [vmem:[%s4635_s1 + $0x1e8] sm:$0xff]   ;;  %v1717_v1 = vrot.slane %v3995_v63, 5 }
  0x3a   : > { %3125 = vmatmul.mubr.bf16.gmra.mrb[4].mxu1 %v4034_v33  ;;  %v4082_v19 = vcombine.low %v952_v6, %v962_v11  ;;  %v971_v36 = vrot.slane %v970_v22, 4  ;;  %v4121_v6 = vld [vmem:[%s3921_s5 + $0x5c] sm:$0x1]  ;;  %v1025_v11 = vshrl.u32 %v4118_v4, 16  ;;  %v1014_v15 = vrot.slane %v1012_v7, 4 }
  0x3b   : > { %3141 = vmatpush3.bf16.msra.mxu1 %v3634_v28  ;;  %3128 = vmatprep.mubr.bf16.mxu1 %v4055_v54  ;;  %v4089_v28 = vld [vmem:[%s3921_s5 + $0x50] sm:$0x1]  ;;  %v1031_v22 = vshll.u32 %v4121_v6, 16 }
  0x3c   : > { %3269 = vmatpush3.bf16.msra.mxu0 %v3635_v39  ;;  %3142 = vmatprep.subr.bf16.mxu1 %v3636_v47  ;;  %v1001_v39 = vshrl.u32 %v4086_v27, 16  ;;  %v1007_v40 = vshll.u32 %v4089_v28, 16  ;;  %v1027_v32 = vrot.slane %v1025_v11, 4 }
  0x3d   : > { %3270 = vmatprep.subr.bf16.mxu0 %v3637_v50  ;;  %3253 = vmatmul.mubr.bf16.gmra.mrb[4].mxu0 %v4082_v19 }
  0x3e   : > { %v1003_v48 = vrot.slane %v1001_v39, 4  ;;  %v1009_v49 = vrot.slane %v1007_v40, 5  ;;  %v1033_v39 = vrot.slane %v1031_v22, 5  ;;  %v834_v40 = vld [vmem:[%s3921_s5 + $0x60] sm:$0xf] }
  0x3f   : > { %3143 = vmatpush3.bf16.msra.mxu1 %v3636_v47  ;;  %v976_v47 = vsel %vm3958_vm5, %v971_v36, %v975_v9  ;;  %v1015_v9 = vshll.u32 %v831_v0, 16 }
  0x40   : > { %3271 = vmatpush3.bf16.msra.mxu0 %v3637_v50  ;;  %3144 = vmatprep.subr.bf16.mxu1 %v3640_v10  ;;  %v994_v50 = vor.u32 %v993_v45, %v990_v44  ;;  %v4110_v59 = vcombine.low %v976_v47, %v986_v52  ;;  %v1004_v61 = vor.u32 %v1003_v48, %v999_v46  ;;  %v1246_v47 = vshrl.u32 %v834_v40, 16 }
  0x41   : > { %3272 = vmatprep.subr.bf16.mxu0 %v3641_v34  ;;  %v1017_v30 = vrot.slane %v1015_v9, 5  ;;  %v1249_v48 = vshll.u32 %v834_v40, 16  ;;  %v1719_v40 = vrot.slane %v1717_v1, 4 }
  0x42   : > { %3129 = vmatmul.mubr.bf16.gmra.mrb[8].mxu1 %v4080_v18  ;;  %v995_v3 = vrot.slane %v994_v50, 4  ;;  %3256 = vmatprep.mubr.bf16.mxu0 %v4110_v59  ;;  %v1005_v8 = vrot.slane %v1004_v61, 4  ;;  %v1248_v0 = vrot.slane %v1246_v47, 4  ;;  %v1724_v47 = vrot.slane %v4023_v24, 5 }
  0x43   : > { %3145 = vmatpush3.bf16.msra.mxu1 %v3640_v10  ;;  %v1021_v10 = vshll.u32 %v4118_v4, 16  ;;  %3132 = vmatprep.mubr.bf16.mxu1 %v4113_v62  ;;  %v1018_v44 = vor.u32 %v1017_v30, %v1014_v15 }
  0x44   : > { %3273 = vmatpush3.bf16.msra.mxu0 %v3641_v34  ;;  %3146 = vmatprep.subr.bf16.mxu1 %v3642_v42  ;;  %v1000_v13 = vsel %vm3958_vm5, %v995_v3, %v999_v46  ;;  %v1010_v29 = vsel %vm3958_vm5, %v1005_v8, %v1009_v49  ;;  %v3647_v34 = vld [vmem:[%s4635_s1 + $0x1f0] sm:$0xff]   ;;  %v4155_v46 = vld [vmem:[%s3921_s5 + $0x68] sm:$0x1]  ;;  %v1251_v3 = vrot.slane %v1249_v48, 5 }
  0x45   : > { %3274 = vmatprep.subr.bf16.mxu0 %v3643_v53  ;;  %v1023_v31 = vrot.slane %v1021_v10, 5  ;;  %v4145_v36 = vcombine.low %v1000_v13, %v1010_v29  ;;  %v1265_v50 = vshll.u32 %v4155_v46, 16  ;;  %v1019_v57 = vrot.slane %v1018_v44, 4  ;;  %v3650_v10 = vld [vmem:[%s3921_s5] sm:$0xff]   ;;  %v3655_v48 = vld [vmem:[%s4635_s1 + $0x190] sm:$0xff]  }
  0x46   : > { %v1252_v15 = vor.u32 %v1251_v3, %v1248_v0  ;;  %v1720_v44 = vrot.slane %v4002_v2, 5  ;;  %v1726_v2 = vrot.slane %v1724_v47, 4  ;;  %v1741_v3 = vrot.slane %v4089_v28, 5 }
  0x47   : > { %3147 = vmatpush3.bf16.msra.mxu1 %v3642_v42  ;;  %v1028_v45 = vor.u32 %v1027_v32, %v1023_v31  ;;  %v4152_v42 = vld [vmem:[%s3921_s5 + $0x64] sm:$0xf]  ;;  %3257 = vmatmul.mubr.bf16.gmra.mrb[8].mxu0 %v4145_v36  ;;  %v1267_v9 = vrot.slane %v1265_v50, 5  ;;  %v1024_v11 = vsel %vm3958_vm5, %v1019_v57, %v1023_v31 }
  0x48   : > { %3275 = vmatpush3.bf16.msra.mxu0 %v3643_v53  ;;  %3148 = vmatprep.subr.bf16.mxu1 %v3646_v23  ;;  %v1255_v49 = vshll.u32 %v4152_v42, 16  ;;  %v1259_v52 = vshrl.u32 %v4152_v42, 16  ;;  %v3649_v53 = vld [vmem:[%s4635_s1 + $0x1f8] sm:$0xff]   ;;  %v1253_v30 = vrot.slane %v1252_v15, 4  ;;  %v3652_v31 = vld [vmem:[%s4635_s1 + $0x80] sm:$0xff]  }
  0x49   : > { %3276 = vmatprep.subr.bf16.mxu0 %v3647_v34  ;;  %v1029_v61 = vrot.slane %v1028_v45, 4 }
  0x4a   : > { %3133 = vmatmul.mubr.bf16.gmra.mrb[12].mxu1 %v4135_v5  ;;  %v1257_v7 = vrot.slane %v1255_v49, 5  ;;  %v1261_v8 = vrot.slane %v1259_v52, 4  ;;  %v4199_v49 = vsel %vm3943_vm4, %v1719_v40, %v1720_v44  ;;  %v1731_v52 = vrot.slane %v4059_v58, 5  ;;  %v3658_v40 = vld [vmem:[%s4635_s1 + $0x98] sm:$0xff]  }
  0x4b   : > { %3149 = vmatpush3.bf16.msra.mxu1 %v3646_v23  ;;  %v1034_v13 = vsel %vm3958_vm5, %v1029_v61, %v1033_v39  ;;  %3152 = vmatprep.mubr.bf16.mxu1 %v3650_v10  ;;  %v3651_v23 = vld [vmem:[%s4635_s1 + $0x180] sm:$0xff]   ;;  %v3653_v39 = vld [vmem:[%s4635_s1 + $0x188] sm:$0xff]   ;;  %v1738_v61 = vrot.slane %v4086_v27, 5  ;;  %v4235_v10 = vld [vmem:[%s3921_s5 + $0x70] sm:$0xf] }
  0x4c   : > { %3277 = vmatpush3.bf16.msra.mxu0 %v3647_v34  ;;  %3150 = vmatprep.subr.bf16.mxu1 %v3648_v43  ;;  %v4170_v22 = vcombine.low %v1024_v11, %v1034_v13  ;;  %v1262_v29 = vor.u32 %v1261_v8, %v1257_v7  ;;  %v1258_v34 = vsel %vm3958_vm5, %v1253_v30, %v1257_v7  ;;  %v1733_v57 = vrot.slane %v1731_v52, 4  ;;  %v837_v7 = vld [vmem:[%s3921_s5 + $0x6c] sm:$0xf]  ;;  %v3656_v13 = vld [vmem:[%s4635_s1 + $0x90] sm:$0xff]  }
  0x4d   : > { %3278 = vmatprep.subr.bf16.mxu0 %v3649_v53  ;;  %v1740_v8 = vrot.slane %v1738_v61, 4  ;;  %v1452_v28 = vshrl.u32 %v837_v7, 16  ;;  %v1455_v11 = vshll.u32 %v837_v7, 16  ;;  %v1465_v30 = vshrl.u32 %v4235_v10, 16  ;;  %v4276_v7 = vld [vmem:[%s3921_s5 + $0x8] sm:$0x1] }
  0x4e   : > { %3260 = vmatprep.mubr.bf16.mxu0 %v4170_v22  ;;  %v1263_v32 = vrot.slane %v1262_v29, 4  ;;  %v1461_v29 = vshll.u32 %v4235_v10, 16 }
  0x4f   : > { %3151 = vmatpush3.bf16.msra.mxu1 %v3648_v43  ;;  %v4243_v15 = vsel %vm3943_vm4, %v1740_v8, %v1741_v3  ;;  %v1467_v44 = vrot.slane %v1465_v30, 4  ;;  %v3665_v30 = vld [vmem:[%s4635_s1 + $0x1b8] sm:$0xff]  }
  0x50   : > { %3279 = vmatpush3.bf16.msra.mxu0 %v3649_v53  ;;  %3168 = vmatprep.subr.bf16.mxu1 %v3651_v23  ;;  %v1268_v43 = vsel %vm3958_vm5, %v1263_v32, %v1267_v9  ;;  %v1734_v53 = vrot.slane %v4062_v60, 5  ;;  %v3654_v60 = vld [vmem:[%s4635_s1 + $0x88] sm:$0xff]   ;;  %v3659_v9 = vld [vmem:[%s4635_s1 + $0x1a0] sm:$0xff]   ;;  %v4252_v32 = vld [vmem:[%s3921_s5 + $0x74] sm:$0x1] }
  0x51   : > { %3296 = vmatprep.subr.bf16.mxu0 %v3652_v31  ;;  %v4190_v45 = vcombine.low %v1258_v34, %v1268_v43  ;;  %v1454_v34 = vrot.slane %v1452_v28, 4  ;;  %v4259_v43 = vrot.slane %v1461_v29, 5  ;;  %v1748_v29 = vrot.slane %v4121_v6, 5  ;;  %v3662_v6 = vld [vmem:[%s4635_s1 + $0xa8] sm:$0xff]  }
  0x52   : > { %3153 = vmatmul.mubr.bf16.vlgmr.msra.gmra.mrb[0].mxu1 %v3927_v12  ;;  %v1727_v12 = vrot.slane %v4026_v25, 5  ;;  %v3657_v25 = vld [vmem:[%s4635_s1 + $0x198] sm:$0xff]   ;;  %v4221_v0 = vsel %vm3943_vm4, %v1733_v57, %v1734_v53  ;;  %v3663_v53 = vld [vmem:[%s4635_s1 + $0x1b0] sm:$0xff]   ;;  %v1657_v57 = vld [vmem:[%s3921_s5] sm:$0xe] }
  0x53   : > { %3169 = vmatpush3.bf16.msra.mxu1 %v3651_v23  ;;  %3156 = vmatprep.mubr.bf16.mxu1 %v3985_v56  ;;  %v3661_v23 = vld [vmem:[%s4635_s1 + $0x1a8] sm:$0xff]  }
  0x54   : > { %3170 = vmatprep.subr.bf16.mxu1 %v3653_v39  ;;  %3261 = vmatmul.mubr.bf16.gmra.mrb[12].mxu0 %v4190_v45  ;;  %v4209_v50 = vsel %vm3943_vm4, %v1726_v2, %v1727_v12  ;;  %v4263_v12 = vld [vmem:[%s3921_s5 + $0x4] sm:$0xf]  ;;  %v1658_v2 = vld [vmem:[%s3921_s5 + $0xc] sm:$0xe] }
  0x55   : > { %3280 = vmatprep.mubr.bf16.mxu0 %v4014_v16  ;;  %v2782_v3 = vrot.slane %v1658_v2, 9  ;;  %v857_v27 = vshrl.u32 %v4263_v12, 16 }
  0x57   : > { %3171 = vmatpush3.bf16.msra.mxu1 %v3653_v39  ;;  %v1457_v39 = vrot.slane %v1455_v11, 5  ;;  %v1704_v11 = vsel %vm3943_vm4, %v2782_v3, %v1703_v21 }
  0x58   : > { %3172 = vmatprep.subr.bf16.mxu1 %v3655_v48 }
  0x5a   : > { %3157 = vmatmul.mubr.bf16.gmra.mrb[4].mxu1 %v4017_v17 }
  0x5b   : > { %3173 = vmatpush3.bf16.msra.mxu1 %v3655_v48  ;;  %3160 = vmatprep.mubr.bf16.mxu1 %v4034_v33  ;;  %v1471_v48 = vshll.u32 %v4252_v32, 16 }
  0x5c   : > { %3174 = vmatprep.subr.bf16.mxu1 %v3657_v25  ;;  %3281 = vmatmul.mubr.bf16.vlgmr.msra.gmra.mrb[0].mxu0 %v4052_v51 }
  0x5d   : > { %3297 = vmatpush3.bf16.msra.mxu0 %v3652_v31  ;;  %3284 = vmatprep.mubr.bf16.mxu0 %v4082_v19  ;;  %v1745_v31 = vrot.slane %v4118_v4, 5  ;;  %v1473_v28 = vrot.slane %v1471_v48, 5  ;;  %v1660_v48 = vld [vmem:[%s3921_s5 + $0x24] sm:$0xe] }
  0x5e   : > { %3298 = vmatprep.subr.bf16.mxu0 %v3654_v60  ;;  %v2784_v2 = vrot.slane %v1660_v48, 9  ;;  %v810_v48 = vld [vmem:[%s3921_s5] sm:$0xf] }
  0x5f   : > { %3175 = vmatpush3.bf16.msra.mxu1 %v3657_v25  ;;  %v1458_v25 = vor.u32 %v1457_v39, %v1454_v34  ;;  %v1747_v8 = vrot.slane %v1745_v31, 4  ;;  %v4292_v34 = vcombine.low %v1704_v11, %v3970_v41  ;;  %v1659_v39 = vld [vmem:[%s3921_s5 + $0x18] sm:$0xe]  ;;  %v1662_v11 = vld [vmem:[%s3921_s5 + $0x3c] sm:$0xe] }
  0x60   : > { %3176 = vmatprep.subr.bf16.mxu1 %v3659_v9  ;;  %v2783_v14 = vrot.slane %v1659_v39, 9  ;;  %v3666_v39 = vld [vmem:[%s4635_s1 + $0xb8] sm:$0xff]  }
  0x61   : > { %3299 = vmatpush3.bf16.msra.mxu0 %v3654_v60  ;;  %v3660_v60 = vld [vmem:[%s4635_s1 + $0xa0] sm:$0xff]   ;;  %v4298_v21 = vsel %vm3943_vm4, %v1747_v8, %v1748_v29 }
  0x62   : > { %3161 = vmatmul.mubr.bf16.gmra.mrb[8].mxu1 %v4055_v54  ;;  %3300 = vmatprep.subr.bf16.mxu0 %v3656_v13  ;;  %v1711_v3 = vsel %vm3943_vm4, %v2783_v14, %v1710_v20  ;;  %v1661_v20 = vld [vmem:[%s3921_s5 + $0x30] sm:$0xe]  ;;  %v853_v14 = vshll.u32 %v4263_v12, 16 }
  0x63   : > { %3177 = vmatpush3.bf16.msra.mxu1 %v3659_v9  ;;  %3164 = vmatprep.mubr.bf16.mxu1 %v4080_v18  ;;  %v1468_v9 = vor.u32 %v1467_v44, %v4259_v43  ;;  %v1459_v44 = vrot.slane %v1458_v25, 4  ;;  %v1699_v25 = vrot.slane %v4276_v7, 5 }
  0x64   : > { %3178 = vmatprep.subr.bf16.mxu1 %v3661_v23  ;;  %3285 = vmatmul.mubr.bf16.gmra.mrb[4].mxu0 %v4110_v59 }
  0x65   : > { %3301 = vmatpush3.bf16.msra.mxu0 %v3656_v13  ;;  %3288 = vmatprep.mubr.bf16.mxu0 %v4145_v36  ;;  %v1696_v13 = vrot.slane %v4263_v12, 5  ;;  %v1469_v41 = vrot.slane %v1468_v9, 4  ;;  %v1718_v9 = vsel %vm3943_vm4, %v2784_v2, %v1717_v1  ;;  %v1464_v63 = vsel %vm3958_vm5, %v1459_v44, %v4259_v43 }
  0x66   : > { %3302 = vmatprep.subr.bf16.mxu0 %v3658_v40  ;;  %v4321_v37 = vcombine.low %v1718_v9, %v4199_v49  ;;  %v1965_v2 = vrot.slane %v4152_v42, 5  ;;  %v3675_v42 = vld [vmem:[%s4635_s1 + $0x60] sm:$0xff]  }
  0x67   : > { %3179 = vmatpush3.bf16.msra.mxu1 %v3661_v23  ;;  %v2781_v23 = vrot.slane %v1657_v57, 9  ;;  %v1698_v8 = vrot.slane %v1696_v13, 4  ;;  %v3667_v57 = vld [vmem:[%s4635_s1 + $0x40] sm:$0xff]   ;;  %v1474_v1 = vsel %vm3958_vm5, %v1469_v41, %v1473_v28 }
  0x68   : > { %3180 = vmatprep.subr.bf16.mxu1 %v3663_v53 }
  0x69   : > { %3303 = vmatpush3.bf16.msra.mxu0 %v3658_v40  ;;  %v4313_v40 = vcombine.low %v1711_v3, %v4125_v38  ;;  %v3664_v38 = vld [vmem:[%s4635_s1 + $0xb0] sm:$0xff]   ;;  %v1697_v49 = vsel %vm3943_vm4, %v2781_v23, %v1696_v13  ;;  %v2772_v13 = vcombine.low %v1464_v63, %v1474_v1  ;;  %v847_v23 = vshll.u32 %v810_v48, 16  ;;  %v3670_v3 = vld [vmem:[%s4635_s1 + $0x148] sm:$0xff]  }
  0x6a   : > { %3165 = vmatmul.mubr.bf16.gmra.mrb[12].mxu1 %v4113_v62  ;;  %3304 = vmatprep.subr.bf16.mxu0 %v3660_v60  ;;  %v1666_v1 = vld [vmem:[%s3921_s5 + $0x6c] sm:$0xe] }
  0x6b   : > { %3181 = vmatpush3.bf16.msra.mxu1 %v3663_v53  ;;  %3184 = vmatprep.mubr.bf16.mxu1 %v3985_v56  ;;  %v2785_v53 = vrot.slane %v1661_v20, 9  ;;  %v2786_v56 = vrot.slane %v1662_v11, 9  ;;  %v849_v41 = vrot.slane %v847_v23, 5  ;;  %v863_v20 = vshll.u32 %v4276_v7, 16 }
  0x6c   : > { %3182 = vmatprep.subr.bf16.mxu1 %v3665_v30  ;;  %3289 = vmatmul.mubr.bf16.gmra.mrb[8].mxu0 %v4170_v22  ;;  %v2157_v11 = vrot.slane %v4235_v10, 5  ;;  %v2160_v7 = vrot.slane %v4252_v32, 5  ;;  %v2847_v10 = vrot.slane %v1666_v1, 9 }
  0x6d   : > { %3305 = vmatpush3.bf16.msra.mxu0 %v3660_v60  ;;  %3292 = vmatprep.mubr.bf16.mxu0 %v4190_v45  ;;  %v1700_v45 = vsel %vm3943_vm4, %v1698_v8, %v1699_v25  ;;  %v1725_v43 = vsel %vm3943_vm4, %v2785_v53, %v1724_v47  ;;  %v3669_v60 = vld [vmem:[%s4635_s1 + $0x48] sm:$0xff]   ;;  %v1732_v29 = vsel %vm3943_vm4, %v2786_v56, %v1731_v52  ;;  %v1664_v52 = vld [vmem:[%s3921_s5 + $0x54] sm:$0xe]  ;;  %v855_v25 = vrot.slane %v853_v14, 5  ;;  %v1665_v8 = vld [vmem:[%s3921_s5 + $0x60] sm:$0xe] }
  0x6e   : > { %3306 = vmatprep.subr.bf16.mxu0 %v3662_v6  ;;  %v4347_v28 = vcombine.low %v1725_v43, %v4209_v50  ;;  %v4355_v24 = vcombine.low %v1732_v29, %v4221_v0  ;;  %v2805_v44 = vcombine.low %v1697_v49, %v1700_v45  ;;  %v3671_v50 = vld [vmem:[%s4635_s1 + $0x50] sm:$0xff]   ;;  %v2821_v53 = vrot.slane %v1665_v8, 9  ;;  %v3677_v56 = vld [vmem:[%s4635_s1 + $0x68] sm:$0xff]   ;;  %v3683_v14 = vld [vmem:[%s4635_s1 + $0x178] sm:$0xff]  }
  0x6f   : > { %3183 = vmatpush3.bf16.msra.mxu1 %v3665_v30  ;;  %v1663_v30 = vld [vmem:[%s3921_s5 + $0x48] sm:$0xe]  ;;  %v2159_v49 = vrot.slane %v2157_v11, 4  ;;  %v4421_v29 = vsel %vm3943_vm4, %v2847_v10, %v2157_v11 }
  0x70   : > { %3200 = vmatprep.subr.bf16.mxu1 %v3667_v57  ;;  %v2787_v47 = vrot.slane %v1663_v30, 9  ;;  %v1966_v63 = vsel %vm3943_vm4, %v2821_v53, %v1965_v2  ;;  %v3674_v30 = vld [vmem:[%s4635_s1 + $0x158] sm:$0xff]  }
  0x71   : > { %3307 = vmatpush3.bf16.msra.mxu0 %v3662_v6  ;;  %v844_v6 = vshrl.u32 %v810_v48, 16  ;;  %v4425_v32 = vsel %vm3943_vm4, %v2159_v49, %v2160_v7 }
  0x72   : > { %3185 = vmatmul.mubr.bf16.vlgmr.msra.gmra.mrb[0].mxu1 %v4017_v17  ;;  %3308 = vmatprep.subr.bf16.mxu0 %v3664_v38  ;;  %v1739_v58 = vsel %vm3943_vm4, %v2787_v47, %v1738_v61  ;;  %v2788_v17 = vrot.slane %v1664_v52, 9  ;;  %v3668_v61 = vld [vmem:[%s4635_s1 + $0x140] sm:$0xff]  }
  0x73   : > { %3201 = vmatpush3.bf16.msra.mxu1 %v3667_v57  ;;  %3188 = vmatprep.mubr.bf16.mxu1 %v4034_v33  ;;  %v4371_v0 = vcombine.low %v1739_v58, %v4243_v15  ;;  %v3673_v15 = vld [vmem:[%s4635_s1 + $0x58] sm:$0xff]   ;;  %v846_v4 = vrot.slane %v844_v6, 4  ;;  %v1968_v57 = vrot.slane %v4155_v46, 5  ;;  %v3672_v46 = vld [vmem:[%s4635_s1 + $0x150] sm:$0xff]   ;;  %v3684_v52 = vld [vmem:[%s4635_s1 + $0x200] sm:$0xff]  }
  0x74   : > { %3202 = vmatprep.subr.bf16.mxu1 %v3669_v60  ;;  %3293 = vmatmul.mubr.bf16.gmra.mrb[12].mxu0 %v2772_v13  ;;  %v1746_v33 = vsel %vm3943_vm4, %v2788_v17, %v1745_v31  ;;  %v859_v31 = vrot.slane %v857_v27, 4  ;;  %v2864_v13 = vcombine.low %v4421_v29, %v4425_v32  ;;  %v3685_v17 = vld [vmem:[%s4635_s1 + $0x208] sm:$0xff]   ;;  %v3686_v27 = vld [vmem:[%s4635_s1 + $0x210] sm:$0xff]  }
  0x75   : > { %3309 = vmatpush3.bf16.msra.mxu0 %v3664_v38  ;;  %3312 = vmatprep.mubr.bf16.mxu0 %v2805_v44  ;;  %v4387_v12 = vcombine.low %v1746_v33, %v4298_v21  ;;  %v1967_v21 = vrot.slane %v1965_v2, 4  ;;  %v3682_v44 = vld [vmem:[%s4635_s1 + $0x78] sm:$0xff]  }
  0x76   : > { %3310 = vmatprep.subr.bf16.mxu0 %v3666_v39  ;;  %v860_v9 = vor.u32 %v859_v31, %v855_v25 }
  0x77   : > { %3203 = vmatpush3.bf16.msra.mxu1 %v3669_v60  ;;  %v865_v60 = vrot.slane %v863_v20, 5 }
  0x78   : > { %3204 = vmatprep.subr.bf16.mxu1 %v3671_v50  ;;  %v861_v43 = vrot.slane %v860_v9, 4 }
  0x79   : > { %3311 = vmatpush3.bf16.msra.mxu0 %v3666_v39  ;;  %v3679_v39 = vld [vmem:[%s3921_s5 + $0x6c] sm:$0xff]  }
  0x7a   : > { %3189 = vmatmul.mubr.bf16.gmra.mrb[4].mxu1 %v4055_v54  ;;  %3328 = vmatprep.subr.bf16.mxu0 %v3668_v61  ;;  %v850_v54 = vor.u32 %v849_v41, %v846_v4  ;;  %v866_v47 = vsel %vm3958_vm5, %v861_v43, %v865_v60 }
  0x7b   : > { %3205 = vmatpush3.bf16.msra.mxu1 %v3671_v50  ;;  %3192 = vmatprep.mubr.bf16.mxu1 %v4080_v18  ;;  %v1969_v18 = vsel %vm3943_vm4, %v1967_v21, %v1968_v57  ;;  %v3681_v50 = vld [vmem:[%s4635_s1 + $0x170] sm:$0xff]   ;;  %v4529_v57 = vld [vmem:[%s4636_s2] ss:$0 sm:$0xff] }
  0x7c   : > { %3206 = vmatprep.subr.bf16.mxu1 %v3673_v15  ;;  %3313 = vmatmul.mubr.bf16.vlgmr.msra.gmra.mrb[0].mxu0 %v4292_v34  ;;  %v4416_v38 = vcombine.low %v1966_v63, %v1969_v18  ;;  %v851_v45 = vrot.slane %v850_v54, 4 }
  0x7d   : > { %3329 = vmatpush3.bf16.msra.mxu0 %v3668_v61  ;;  %3316 = vmatprep.mubr.bf16.mxu0 %v4313_v40 }
  0x7e   : > { %3330 = vmatprep.subr.bf16.mxu0 %v3670_v3  ;;  %v856_v26 = vsel %vm3958_vm5, %v851_v45, %v855_v25 }
  0x7f   : > { %3207 = vmatpush3.bf16.msra.mxu1 %v3673_v15  ;;  %v2715_v58 = vcombine.low %v856_v26, %v866_v47 }
  0x80   : > { %3208 = vmatprep.subr.bf16.mxu1 %v3675_v42 }
  0x81   : > { %3331 = vmatpush3.bf16.msra.mxu0 %v3670_v3 }
  0x82   : > { %3193 = vmatmul.mubr.bf16.gmra.mrb[8].mxu1 %v4113_v62  ;;  %3332 = vmatprep.subr.bf16.mxu0 %v3672_v46  ;;  %v3680_v62 = vld [vmem:[%s4635_s1 + $0x70] sm:$0xff]  }
  0x83   : > { %3209 = vmatpush3.bf16.msra.mxu1 %v3675_v42  ;;  %3196 = vmatprep.mubr.bf16.mxu1 %v4135_v5  ;;  %v3676_v5 = vld [vmem:[%s4635_s1 + $0x160] sm:$0xff]  }
  0x84   : > { %3210 = vmatprep.subr.bf16.mxu1 %v3677_v56  ;;  %3317 = vmatmul.mubr.bf16.gmra.mrb[4].mxu0 %v4321_v37 }
  0x85   : > { %3333 = vmatpush3.bf16.msra.mxu0 %v3672_v46  ;;  %3320 = vmatprep.mubr.bf16.mxu0 %v4347_v28 }
  0x86   : > { %3334 = vmatprep.subr.bf16.mxu0 %v3674_v30 }
  0x87   : > { %3211 = vmatpush3.bf16.msra.mxu1 %v3677_v56 }
  0x88   : > { %3212 = vmatprep.subr.bf16.mxu1 %v3680_v62 }
  0x89   : > { %3335 = vmatpush3.bf16.msra.mxu0 %v3674_v30 }
  0x8a   : > { %3197 = vmatmul.mubr.bf16.gmra.mrb[12].mxu1 %v3679_v39  ;;  %3336 = vmatprep.subr.bf16.mxu0 %v3676_v5 }
  0x8b   : > { %3213 = vmatpush3.bf16.msra.mxu1 %v3680_v62  ;;  %3216 = vmatprep.mubr.bf16.mxu1 %v2715_v58 }
  0x8c   : > { %3214 = vmatprep.subr.bf16.mxu1 %v3682_v44  ;;  %3321 = vmatmul.mubr.bf16.gmra.mrb[8].mxu0 %v4355_v24 }
  0x8d   : > { %3337 = vmatpush3.bf16.msra.mxu0 %v3676_v5  ;;  %3324 = vmatprep.mubr.bf16.mxu0 %v4371_v0 }
  0x8e   : > { %3338 = vmatprep.subr.bf16.mxu0 %v3678_v35 }
  0x8f   : > { %3215 = vmatpush3.bf16.msra.mxu1 %v3682_v44 }
  0x90   : > { %3392 = vmatprep.subr.bf16.mxu1 %v3684_v52 }
  0x91   : > { %3339 = vmatpush3.bf16.msra.mxu0 %v3678_v35 }
  0x92   : > { %3217 = vmatmul.mubr.bf16.vlgmr.msra.gmra.mrb[0].mxu1 %v3982_v55  ;;  %3340 = vmatprep.subr.bf16.mxu0 %v3681_v50  ;;  %v3687_v55 = vld [vmem:[%s4635_s1 + $0x218] sm:$0xff]  }
  0x93   : > { %3400 = vmatpush3.bf16.msra.mxu1 %v3684_v52  ;;  %3220 = vmatprep.mubr.bf16.mxu1 %v4014_v16  ;;  %v3688_v16 = vld [vmem:[%s4635_s1 + $0x220] sm:$0xff]  }
  0x94   : > { %3393 = vmatprep.subr.bf16.mxu1 %v3685_v17  ;;  %3325 = vmatmul.mubr.bf16.gmra.mrb[12].mxu0 %v4387_v12 }
  0x95   : > { %3341 = vmatpush3.bf16.msra.mxu0 %v3681_v50  ;;  %3344 = vmatprep.mubr.bf16.mxu0 %v4292_v34 }
  0x96   : > { %3342 = vmatprep.subr.bf16.mxu0 %v3683_v14 }
  0x97   : > { %3401 = vmatpush3.bf16.msra.mxu1 %v3685_v17 }
  0x98   : > { %3394 = vmatprep.subr.bf16.mxu1 %v3686_v27 }
  0x99   : > { %3343 = vmatpush3.bf16.msra.mxu0 %v3683_v14 }
  0x9a   : > { %3221 = vmatmul.mubr.bf16.gmra.mrb[4].mxu1 %v4052_v51  ;;  %3360 = vmatprep.subr.bf16.mxu0 %v3684_v52  ;;  %v3689_v51 = vld [vmem:[%s4635_s1 + $0x228] sm:$0xff]  }
  0x9b   : > { %3402 = vmatpush3.bf16.msra.mxu1 %v3686_v27  ;;  %3224 = vmatprep.mubr.bf16.mxu1 %v4082_v19  ;;  %v3690_v19 = vld [vmem:[%s4635_s1 + $0x230] sm:$0xff]  }
  0x9c   : > { %3395 = vmatprep.subr.bf16.mxu1 %v3687_v55  ;;  %3345 = vmatmul.mubr.bf16.vlgmr.msra.gmra.mrb[0].mxu0 %v4313_v40 }
  0x9d   : > { %3361 = vmatpush3.bf16.msra.mxu0 %v3684_v52  ;;  %3348 = vmatprep.mubr.bf16.mxu0 %v4321_v37 }
  0x9e   : > { %3362 = vmatprep.subr.bf16.mxu0 %v3685_v17 }
  0x9f   : > { %3403 = vmatpush3.bf16.msra.mxu1 %v3687_v55 }
  0xa0   : > { %3396 = vmatprep.subr.bf16.mxu1 %v3688_v16 }
  0xa1   : > { %3363 = vmatpush3.bf16.msra.mxu0 %v3685_v17 }
  0xa2   : > { %3225 = vmatmul.mubr.bf16.gmra.mrb[8].mxu1 %v4110_v59  ;;  %3364 = vmatprep.subr.bf16.mxu0 %v3686_v27  ;;  %v3691_v59 = vld [vmem:[%s4635_s1 + $0x238] sm:$0xff]  }
  0xa3   : > { %3404 = vmatpush3.bf16.msra.mxu1 %v3688_v16  ;;  %3228 = vmatprep.mubr.bf16.mxu1 %v4145_v36 }
  0xa4   : > { %3397 = vmatprep.subr.bf16.mxu1 %v3689_v51  ;;  %3349 = vmatmul.mubr.bf16.gmra.mrb[4].mxu0 %v4347_v28 }
  0xa5   : > { %3365 = vmatpush3.bf16.msra.mxu0 %v3686_v27  ;;  %3352 = vmatprep.mubr.bf16.mxu0 %v4355_v24 }
  0xa6   : > { %3366 = vmatprep.subr.bf16.mxu0 %v3687_v55 }
  0xa7   : > { %3405 = vmatpush3.bf16.msra.mxu1 %v3689_v51 }
  0xa8   : > { %3398 = vmatprep.subr.bf16.mxu1 %v3690_v19 }
  0xa9   : > { %3367 = vmatpush3.bf16.msra.mxu0 %v3687_v55 }
  0xaa   : > { %3229 = vmatmul.mubr.bf16.gmra.mrb[12].mxu1 %v4170_v22  ;;  %3368 = vmatprep.subr.bf16.mxu0 %v3688_v16 }
  0xab   : > { %3406 = vmatpush3.bf16.msra.mxu1 %v3690_v19  ;;  %3384 = vmatprep.mubr.bf16.mxu1 %v4371_v0 }
  0xac   : > { %3399 = vmatprep.subr.bf16.mxu1 %v3691_v59  ;;  %3353 = vmatmul.mubr.bf16.gmra.mrb[8].mxu0 %v4371_v0 }
  0xad   : > { %3369 = vmatpush3.bf16.msra.mxu0 %v3688_v16  ;;  %3356 = vmatprep.mubr.bf16.mxu0 %v4387_v12 }
  0xae   : > { %3370 = vmatprep.subr.bf16.mxu0 %v3689_v51 }
  0xaf   : > { %3407 = vmatpush3.bf16.msra.mxu1 %v3691_v59 }
  0xb1   : > { %3371 = vmatpush3.bf16.msra.mxu0 %v3689_v51 }
  0xb2   : > { %3385 = vmatmul.mubr.bf16.vlgmr.msra.gmra.mrb[16].mxu1 %v4387_v12  ;;  %3372 = vmatprep.subr.bf16.mxu0 %v3690_v19 }
  0xb3   : > { %3388 = vmatprep.mubr.bf16.mxu1 %v4416_v38 }
  0xb4   : > { %3357 = vmatmul.mubr.bf16.gmra.mrb[12].mxu0 %v4416_v38 }
  0xb5   : > { %3373 = vmatpush3.bf16.msra.mxu0 %v3690_v19  ;;  %3376 = vmatprep.mubr.bf16.mxu0 %v4313_v40 }
  0xb6   : > { %3374 = vmatprep.subr.bf16.mxu0 %v3691_v59 }
  0xb9   : > { %3375 = vmatpush3.bf16.msra.mxu0 %v3691_v59 }
  0xba   : > { %3389 = vmatmul.mubr.bf16.gmra.mrb[20].mxu1 %v2864_v13 }
  0xbc   : > { %3377 = vmatmul.mubr.bf16.vlgmr.msra.gmra.mrb[0].mxu0 %v4321_v37 }
  0xbd   : > { %3380 = vmatprep.mubr.bf16.mxu0 %v4347_v28 }
  0xc4   : > { %3381 = vmatmul.mubr.bf16.gmra.mrb[4].mxu0 %v4355_v24 }
 0x165   : > { %v4510_v36 = vpop.f32.mrb[0].mxu1 }
 0x166   : > { %v4512_v22 = vpop.f32.mrb[1].mxu1 }
 0x167   : > { %v4514_v34 = vpop.f32.mrb[2].mxu1 }
 0x168   : > { %v4516_v0 = vpop.f32.mrb[3].mxu1 }
 0x16d   : > { %v4518_v40 = vpop.f32.mrb[4].mxu1 }
 0x16e   : > { %v4520_v61 = vpop.f32.mrb[5].mxu1 }
 0x16f   : > { %v4522_v33 = vpop.f32.mrb[6].mxu1 }
 0x170   : > { %v4524_v48 = vpop.f32.mrb[7].mxu1 }
 0x175   : > { %v3226_v37 = vpop.f32.mrb[8].mxu1 }
 0x176   : > { %v1198_v28 = vpop.f32.mrb[9].mxu1 }
 0x177   : > { %v3227_v15 = vpop.f32.mrb[10].mxu1 }
 0x178   : > { %v1201_v24 = vpop.f32.mrb[11].mxu1 }
 0x17d   : > { %v3230_v12 = vpop.f32.mrb[12].mxu1 }
 0x17e   : > { %v1214_v6 = vpop.f32.mrb[13].mxu1 }
 0x17f   : > { %v3231_v23 = vpop.f32.mrb[14].mxu1  ;;  %v3354_v2 = vpop.f32.mrb[8].mxu0 }
 0x180   : > { %v1217_v4 = vpop.f32.mrb[15].mxu1  ;;  %v3416_v41 = vadd.f32 %v3354_v2, %v3226_v37  ;;  %v2105_v25 = vpop.f32.mrb[9].mxu0 }
 0x181   : > { %v3418_v31 = vadd.f32 %v2105_v25, %v1198_v28  ;;  %v3355_v3 = vpop.f32.mrb[10].mxu0 }
 0x182   : > { %v3420_v21 = vadd.f32 %v3355_v3, %v3227_v15  ;;  %v2108_v42 = vpop.f32.mrb[11].mxu0 }
 0x183   : > { %v3422_v8 = vadd.f32 %v2108_v42, %v1201_v24 }
 0x185   : > { %v3386_v54 = vpop.f32.mrb[16].mxu1 }
 0x186   : > { %v3417_v9 = vadd.f32 %v3416_v41, %v3386_v54  ;;  %v2297_v20 = vpop.f32.mrb[17].mxu1 }
 0x187   : > { %v3419_v53 = vadd.f32 %v3418_v31, %v2297_v20  ;;  %v3387_v18 = vpop.f32.mrb[18].mxu1  ;;  %v3358_v11 = vpop.f32.mrb[12].mxu0 }
 0x188   : > { %v2361_v46 = vadd.f32 %v3417_v9, %v4529_v57  ;;  %v3421_v63 = vadd.f32 %v3420_v21, %v3387_v18  ;;  %v2300_v1 = vpop.f32.mrb[19].mxu1  ;;  %v3424_v7 = vadd.f32 %v3358_v11, %v3230_v12  ;;  %v2121_v56 = vpop.f32.mrb[13].mxu0 }
 0x189   : > { %v2359_v38 = vadd.f32 %v3419_v53, %v4529_v57  ;;  %v3423_v10 = vadd.f32 %v3422_v8, %v2300_v1  ;;  %v3426_v49 = vadd.f32 %v2121_v56, %v1214_v6  ;;  %v3359_v45 = vpop.f32.mrb[14].mxu0 }
 0x18a   : > { %v2393_v43 = vmul.f32 0.01, %v2361_v46  ;;  %v2362_v60 = vadd.f32 %v3421_v63, %v4529_v57  ;;  %v3428_v29 = vadd.f32 %v3359_v45, %v3231_v23  ;;  %v2124_v32 = vpop.f32.mrb[15].mxu0  ;;  %vm2377_vm6 = vcmp.ge.f32.partialorder %v2361_v46, 0.0 }
 0x18b   : > { %v2391_v30 = vmul.f32 0.01, %v2359_v38  ;;  %v2360_v13 = vadd.f32 %v3423_v10, %v4529_v57  ;;  %v3430_v62 = vadd.f32 %v2124_v32, %v1217_v4  ;;  %vm2375_vm7 = vcmp.ge.f32.partialorder %v2359_v38, 0.0 }
 0x18c   : > { %vm2378_vm8 = vcmp.ge.f32.partialorder %v2362_v60, 0.0  ;;  %v2394_v26 = vmul.f32 0.01, %v2362_v60  ;;  %v2409_v5 = vsel %vm2377_vm6, %v2361_v46, %v2393_v43 }
 0x18d   : > { %vm2376_vm9 = vcmp.ge.f32.partialorder %v2360_v13, 0.0  ;;  %v2392_v47 = vmul.f32 0.01, %v2360_v13  ;;  %v3390_v39 = vpop.f32.mrb[20].mxu1  ;;  %v2407_v52 = vsel %vm2375_vm7, %v2359_v38, %v2391_v30 }
 0x18e   : > { %v2410_v44 = vsel %vm2378_vm8, %v2362_v60, %v2394_v26  ;;  %v3425_v58 = vadd.f32 %v3424_v7, %v3390_v39  ;;  %v2313_v35 = vpop.f32.mrb[21].mxu1 }
 0x18f   : > { %v2941_v50 = vpack.c.bf16 %v2410_v44, %v2409_v5  ;;  %v2408_v17 = vsel %vm2376_vm9, %v2360_v13, %v2392_v47  ;;  %v3427_v14 = vadd.f32 %v3426_v49, %v2313_v35  ;;  %v3391_v27 = vpop.f32.mrb[22].mxu1  ;;  %v3378_v55 = vpop.f32.mrb[0].mxu0 }
 0x190   : > { %v2936_v16 = vpack.c.bf16 %v2408_v17, %v2407_v52  ;;  %v2365_v51 = vadd.f32 %v3425_v58, %v4529_v57  ;;  %v3429_v19 = vadd.f32 %v3428_v29, %v3391_v27  ;;  %v2316_v59 = vpop.f32.mrb[23].mxu1  ;;  %v3408_v37 = vadd.f32 %v3378_v55, %v4510_v36  ;;  %v2265_v28 = vpop.f32.mrb[1].mxu0 }
 0x191   : > { %2957 = vst [vmem:[%s4540_s20 + $0x28] sm:$0xff] %v2941_v50   ;;  %v2363_v15 = vadd.f32 %v3427_v14, %v4529_v57  ;;  %v3431_v24 = vadd.f32 %v3430_v62, %v2316_v59  ;;  %v3409_v12 = vadd.f32 %v2265_v28, %v4512_v22  ;;  %v3379_v6 = vpop.f32.mrb[2].mxu0 }
 0x192   : > { %2956 = vst [vmem:[%s4540_s20 + $0x20] sm:$0xff] %v2936_v16   ;;  %vm2381_vm10 = vcmp.ge.f32.partialorder %v2365_v51, 0.0  ;;  %v2397_v23 = vmul.f32 0.01, %v2365_v51  ;;  %v2366_v2 = vadd.f32 %v3429_v19, %v4529_v57  ;;  %v2353_v4 = vadd.f32 %v3408_v37, %v4529_v57  ;;  %v2268_v41 = vpop.f32.mrb[3].mxu0 }
 0x193   : > { %v3410_v36 = vadd.f32 %v3379_v6, %v4514_v34  ;;  %vm2379_vm11 = vcmp.ge.f32.partialorder %v2363_v15, 0.0  ;;  %v2351_v25 = vadd.f32 %v3409_v12, %v4529_v57  ;;  %v3411_v31 = vadd.f32 %v2268_v41, %v4516_v0 }
 0x194   : > { %v2413_v3 = vsel %vm2381_vm10, %v2365_v51, %v2397_v23  ;;  %v2395_v21 = vmul.f32 0.01, %v2363_v15  ;;  %vm2369_vm12 = vcmp.ge.f32.partialorder %v2353_v4, 0.0  ;;  %v2385_v22 = vmul.f32 0.01, %v2353_v4 }
 0x195   : > { %v2354_v42 = vadd.f32 %v3410_v36, %v4529_v57  ;;  %vm2382_vm13 = vcmp.ge.f32.partialorder %v2366_v2, 0.0  ;;  %vm2367_vm14 = vcmp.ge.f32.partialorder %v2351_v25, 0.0  ;;  %v2383_v8 = vmul.f32 0.01, %v2351_v25 }
 0x196   : > { %v2352_v54 = vadd.f32 %v3411_v31, %v4529_v57  ;;  %v2398_v9 = vmul.f32 0.01, %v2366_v2  ;;  %v2401_v34 = vsel %vm2369_vm12, %v2353_v4, %v2385_v22  ;;  %v2364_v53 = vadd.f32 %v3431_v24, %v4529_v57 }
 0x197   : > { %vm2370_vm15 = vcmp.ge.f32.partialorder %v2354_v42, 0.0  ;;  %v2386_v20 = vmul.f32 0.01, %v2354_v42  ;;  %v2399_v0 = vsel %vm2367_vm14, %v2351_v25, %v2383_v8  ;;  %v3382_v11 = vpop.f32.mrb[4].mxu0  ;;  %v2411_v13 = vsel %vm2379_vm11, %v2363_v15, %v2395_v21 }
 0x198   : > { %vm2368_vm0 = vcmp.ge.f32.partialorder %v2352_v54, 0.0  ;;  %v2384_v18 = vmul.f32 0.01, %v2352_v54  ;;  %v2414_v46 = vsel %vm2382_vm13, %v2366_v2, %v2398_v9  ;;  %v3412_v1 = vadd.f32 %v3382_v11, %v4518_v40  ;;  %v2281_v7 = vpop.f32.mrb[5].mxu0 }
 0x199   : > { %v2402_v63 = vsel %vm2370_vm15, %v2354_v42, %v2386_v20  ;;  %v2951_v56 = vpack.c.bf16 %v2414_v46, %v2413_v3  ;;  %vm2380_vm1 = vcmp.ge.f32.partialorder %v2364_v53, 0.0  ;;  %v3413_v49 = vadd.f32 %v2281_v7, %v4520_v61  ;;  %v3383_v45 = vpop.f32.mrb[6].mxu0 }
 0x19a   : > { %v2921_v38 = vpack.c.bf16 %v2402_v63, %v2401_v34  ;;  %v2400_v10 = vsel %vm2368_vm0, %v2352_v54, %v2384_v18  ;;  %v2396_v43 = vmul.f32 0.01, %v2364_v53  ;;  %v2357_v29 = vadd.f32 %v3412_v1, %v4529_v57  ;;  %v2284_v40 = vpop.f32.mrb[7].mxu0 }
 0x19b   : > { %v2916_v60 = vpack.c.bf16 %v2400_v10, %v2399_v0  ;;  %v3414_v32 = vadd.f32 %v3383_v45, %v4522_v33  ;;  %2959 = vst [vmem:[%s4540_s20 + $0x38] sm:$0xff] %v2951_v56   ;;  %v2355_v30 = vadd.f32 %v3413_v49, %v4529_v57  ;;  %v3415_v62 = vadd.f32 %v2284_v40, %v4524_v48 }
 0x19c   : > { %2953 = vst [vmem:[%s4540_s20 + $0x8] sm:$0xff] %v2921_v38   ;;  %v2412_v61 = vsel %vm2380_vm1, %v2364_v53, %v2396_v43  ;;  %v2389_v26 = vmul.f32 0.01, %v2357_v29  ;;  %vm2373_vm2 = vcmp.ge.f32.partialorder %v2357_v29, 0.0 }
 0x19d   : > { %2917 = vst [vmem:[%s4540_s20] sm:$0xff] %v2916_v60   ;;  %v2358_v47 = vadd.f32 %v3414_v32, %v4529_v57  ;;  %v2946_v39 = vpack.c.bf16 %v2412_v61, %v2411_v13  ;;  %v2387_v33 = vmul.f32 0.01, %v2355_v30  ;;  %v2356_v5 = vadd.f32 %v3415_v62, %v4529_v57 }
 0x19e   : > { %vm2371_vm3 = vcmp.ge.f32.partialorder %v2355_v30, 0.0  ;;  %v2405_v58 = vsel %vm2373_vm2, %v2357_v29, %v2389_v26 }
 0x19f   : > { %vm2374_vm4 = vcmp.ge.f32.partialorder %v2358_v47, 0.0  ;;  %v2390_v44 = vmul.f32 0.01, %v2358_v47  ;;  %2958 = vst [vmem:[%s4540_s20 + $0x30] sm:$0xff] %v2946_v39   ;;  %vm2372_vm5 = vcmp.ge.f32.partialorder %v2356_v5, 0.0  ;;  %v2403_v52 = vsel %vm2371_vm3, %v2355_v30, %v2387_v33 }
 0x1a0   : > { %v2388_v48 = vmul.f32 0.01, %v2356_v5 }
 0x1a1   : > { %v2406_v35 = vsel %vm2374_vm4, %v2358_v47, %v2390_v44 }
 0x1a2   : > { %v2931_v50 = vpack.c.bf16 %v2406_v35, %v2405_v58  ;;  %v2404_v17 = vsel %vm2372_vm5, %v2356_v5, %v2388_v48 }
 0x1a3   : > { %v2926_v57 = vpack.c.bf16 %v2404_v17, %v2403_v52 }
 0x1a4   : > { %2955 = vst [vmem:[%s4540_s20 + $0x18] sm:$0xff] %v2931_v50  }
 0x1a5   : > { %2954 = vst [vmem:[%s4540_s20 + $0x10] sm:$0xff] %v2926_v57  }
 0x1a6   : > { %3705 = shalt.err (!%p3702_p6)
}
 0x1a7   : > { %s3706_s10 = scalar_lea.hbm %s4574_s4, 1024  ;;  %s3710_s21 = scalar_lea.hbm %s4637_s3, 4096 }
 0x1a8   : > { %p3707_p7 = scmp.ne.s32.totalorder %s4574_s4, %s3706_s10  ;;  %p3711_p11 = scmp.lt.u32.totalorder %s4574_s4, %s4637_s3 }
 0x1a9   : > { %p3712_p12 = scmp.lt.u32.totalorder %s3710_s21, %s3706_s10  ;;  %p3714_p0 = scmp.lt.u32.totalorder %s3706_s10, %s4574_s4 }
 0x1aa   : > { %p3708_p9 = pnand %p3707_p7, %p3862_p3 }
 0x1ab   : > { %p3713_p13 = por %p3712_p12, %p3711_p11 }
 0x1ac   : > { %p3709_p10 = pneg %p3708_p9 }
 0x1ad   : > { %p3715_p1 = por %p3714_p0, %p3713_p13 }
 0x1af   : > { %p3716_p2 = pnand %p3715_p1, %p3709_p10 }
 0x1b1   : > { %3719 = shalt.err (!%p3716_p2)
}
 0x1b2   : > { %s3789_s16 = smov 64   ;;  %s3790_s5 = smov 4  }
 0x1b3   : > { %3537 = dma.vmem_to_hbm [thread:$0]  (%p3862_p3), %s4576_s27, 1024, %s4574_s4, %s4582_s29, %s3789_s16, %s3789_s16, %s3790_s5  }
 0x1b4 PF: > { %p3543_p4 = scmp.ge.s32.totalorder %s3786_s19, 2  ;;  %s2527_s28 = sand.u32 1, %s3758_s12  }
 0x1b5   : > { %s2528_s6 = scalar_lea.sflag [#allocation3], %s2527_s28 }
 0x1b6   : > { %p3540_p5 = pnand %p3543_p4, %p3871_p8 }
 0x1b8   : > { %3753 = dma.done.wait (!%p3540_p5), %s2528_s6, 1024  }
 0x1b9   : > { %3755 = vsyncadd (!%p3540_p5), %s2528_s6, 4294966272  ;;  %s16_s19 = sadd.s32 1, %s3786_s19   ;;  %s4644_s12 = smov %s3762_s13 }
 0x1ba   : > { %p13_p6 = scmp.ge.s32.totalorder %s16_s19, 6   ;;  %s4645_s13 = smov %s3766_s14 }
 0x1bb   : > { %s4646_s14 = smov %s3880_s30  ;;  %s4647_s15 = smov %s3778_s17 }
 0x1bc   : > { %s4648_s16 = smov %s3782_s18  ;;  %s4649_s17 = smov %s4652_s22 }
 0x1bd   : > { %s4650_s18 = smov %s4656_s23  ;;  %15 = sbr.rel (!%p13_p6) target bundleno = 5 (0x5), region = 82 }
 0x1c4   :  { %2533 = vsyncpa [#allocation3], 1 }
 0x1c5   :  { %2535 = vsyncpa [#allocation3 + $0x1], 1 }

</bundles_post_ra>
